<compile_context>
chip_gen: v5e
topology: v5e:2x2
jax: 0.10.0
libtpu: 0.0.40
codegen_flags: <defaults>
</compile_context>

<pallas_src>
import functools

import jax
import jax.numpy as jnp
from jax.experimental import pallas as pl
from jax.experimental.pallas import tpu as pltpu


# ---------------------------------------------------------------------------
# Kernel: depthwise grouped-conv maxout difference
#   z[c] = max_mu(conv1[c,mu](gin) + b1[c,mu]) - max_mu(conv2[c,mu](gin) + b2[c,mu])
# ---------------------------------------------------------------------------
def _maxout_kernel(g_ref, w1_ref, b1_ref, w2_ref, b2_ref, z_ref, *,
                   H, Wp, km, nmax):
    # g_ref : (1, Ct, Lpad)      zero-padded input, padded spatial flattened
    # wX_ref: (Ct, nmax*km*km)   compact per-channel weights
    # bX_ref: (Ct, nmax)         compact per-channel biases
    # z_ref : (1, Ct, H*Wp)      lane-dense output slab (cols >= W are wrap junk)
    KK = km * km
    LHW = H * Wp

    w1 = w1_ref[...]
    w2 = w2_ref[...]
    b1 = b1_ref[...]
    b2 = b2_ref[...]

    # km*km distinct shifted windows, hoisted once and shared between both
    # branches and all maxout units.
    taps = [g_ref[0, :, i * Wp + j: i * Wp + j + LHW]
            for i in range(km) for j in range(km)]

    best1 = None
    best2 = None
    for mu in range(nmax):
        c0 = mu * KK
        # Fold the bias into the first accumulate; keep the two branches as
        # independent chains so the scheduler can interleave them.
        acc1 = w1[:, c0:c0 + 1] * taps[0] + b1[:, mu:mu + 1]
        acc2 = w2[:, c0:c0 + 1] * taps[0] + b2[:, mu:mu + 1]
        for t in range(1, KK):
            c = c0 + t
            acc1 = acc1 + w1[:, c:c + 1] * taps[t]
            acc2 = acc2 + w2[:, c:c + 1] * taps[t]
        best1 = acc1 if best1 is None else jnp.maximum(best1, acc1)
        best2 = acc2 if best2 is None else jnp.maximum(best2, acc2)

    z_ref[0] = best1 - best2


# ---------------------------------------------------------------------------
# Wrapper
# ---------------------------------------------------------------------------
def maxout_forward(params, x, u=None, num_max=4):
    w1, b1 = params["conv1_w"], params["conv1_b"]
    w2, b2 = params["conv2_w"], params["conv2_b"]
    B, C, H, W = x.shape
    km = int(w1.shape[-1])
    KK = km * km
    pad = km // 2

    # TODO(synk): Dropout2d is eval-mode identity here.
    gin = x if u is None else x + u

    # zero-pad spatially, flatten padded spatial to a lane-dense axis
    gp = jnp.pad(gin, ((0, 0), (0, 0), (pad, pad), (pad, pad))).astype(jnp.float32)
    Hp, Wp = H + 2 * pad, W + 2 * pad
    Lp = Hp * Wp
    LHW = H * Wp
    # furthest tap reads LHW elements starting at (km-1)*(Wp+1); lane-align
    Lneed = LHW + (km - 1) * (Wp + 1)
    Lpad = ((max(Lp, Lneed) + 127) // 128) * 128
    gflat = jnp.pad(gp.reshape(B, C, Lp), ((0, 0), (0, 0), (0, Lpad - Lp)))

    # PyTorch grouped-conv weight (C*num_max, 1, km, km), out ch = c*num_max+mu
    def prep_w(w):   # -> (C, num_max*KK), column = mu*KK + tap
        return w.reshape(C, num_max * KK).astype(jnp.float32)

    def prep_b(b):   # -> (C, num_max)
        return b.reshape(C, num_max).astype(jnp.float32)

    w1c, b1c = prep_w(w1), prep_b(b1)
    w2c, b2c = prep_w(w2), prep_b(b2)

    # channel tile: multiple of 8 sublanes when possible, else the full C
    Ct = 8 if C % 8 == 0 else C
    grid = (B, C // Ct)

    kern = functools.partial(_maxout_kernel, H=H, Wp=Wp, km=km, nmax=num_max)
    z_flat = pl.pallas_call(
        kern,
        out_shape=jax.ShapeDtypeStruct((B, C, LHW), jnp.float32),
        grid=grid,
        in_specs=[
            pl.BlockSpec((1, Ct, Lpad), lambda b, c: (b, c, 0)),
            pl.BlockSpec((Ct, num_max * KK), lambda b, c: (c, 0)),
            pl.BlockSpec((Ct, num_max), lambda b, c: (c, 0)),
            pl.BlockSpec((Ct, num_max * KK), lambda b, c: (c, 0)),
            pl.BlockSpec((Ct, num_max), lambda b, c: (c, 0)),
        ],
        out_specs=pl.BlockSpec((1, Ct, LHW), lambda b, c: (b, c, 0)),
        compiler_params=pltpu.CompilerParams(
            dimension_semantics=("parallel", "parallel")),
    )(gflat, w1c, b1c, w2c, b2c)

    # drop the row-wrap columns (w >= W) and restore (B, C, H, W)
    return z_flat.reshape(B, C, H, Wp)[:, :, :, :W]


# ---------------------------------------------------------------------------
# Parameter init (matches nn.Conv2d(in_nc, in_nc*num_max, k, groups=in_nc))
# ---------------------------------------------------------------------------
def init_params(key, in_nc, num_max=4, kernel_size=3):
    k1, k2, k3, k4 = jax.random.split(key, 4)
    mo = in_nc * num_max
    return dict(
        conv1_w=0.2 * jax.random.normal(k1, (mo, 1, kernel_size, kernel_size),
                                        jnp.float32),
        conv1_b=0.2 * jax.random.normal(k2, (mo,), jnp.float32),
        conv2_w=0.2 * jax.random.normal(k3, (mo, 1, kernel_size, kernel_size),
                                        jnp.float32),
        conv2_b=0.2 * jax.random.normal(k4, (mo,), jnp.float32),
    )


# ---------------------------------------------------------------------------
# Pure-JAX reference (lax grouped conv) for validation
# ---------------------------------------------------------------------------
def reference_forward(params, x, u=None, num_max=4):
    gin = x if u is None else x + u
    B, C, H, W = x.shape

    def branch(w, b):
        p = w.shape[-1] // 2
        out = jax.lax.conv_general_dilated(
            gin, w, (1, 1), ((p, p), (p, p)),
            dimension_numbers=("NCHW", "OIHW", "NCHW"),
            feature_group_count=C)
        out = out + b.reshape(1, -1, 1, 1)
        return out.reshape(B, C, num_max, H, W).max(axis=2)

    return branch(params["conv1_w"], params["conv1_b"]) - \
        branch(params["conv2_w"], params["conv2_b"])


# ---------------------------------------------------------------------------
if __name__ == "__main__":
    B, C, H, W = 2, 16, 16, 16
    NMAX, KM = 4, 3

    key = jax.random.PRNGKey(0)
    kx, ku, kp = jax.random.split(key, 3)
    x = jax.random.normal(kx, (B, C, H, W), jnp.float32)
    u = jax.random.normal(ku, (B, C, H, W), jnp.float32)
    params = init_params(kp, C, num_max=NMAX, kernel_size=KM)

    fwd = jax.jit(lambda p, xx, uu=None: maxout_forward(p, xx, uu, num_max=NMAX))

    z = fwd(params, x)          # u is None path
    zu = fwd(params, x, u)      # x + u path
    jax.block_until_ready((z, zu))

    z_ref = reference_forward(params, x, None, NMAX)
    zu_ref = reference_forward(params, x, u, NMAX)
    err = float(jnp.max(jnp.abs(z - z_ref)))
    erru = float(jnp.max(jnp.abs(zu - zu_ref)))
    assert err < 1e-3, f"maxout mismatch (u=None): max abs err {err}"
    assert erru < 1e-3, f"maxout mismatch (u given): max abs err {erru}"

    print("KERNEL_OK")
</pallas_src>

<mosaic_0001>
module attributes {stable_mosaic.version = 11 : i64} {
  func.func @_maxout_kernel(%arg0: i32, %arg1: i32, %arg2: memref<1x8x384xf32, #tpu.memory_space<vmem>>, %arg3: memref<8x36xf32, #tpu.memory_space<vmem>>, %arg4: memref<8x4xf32, #tpu.memory_space<vmem>>, %arg5: memref<8x36xf32, #tpu.memory_space<vmem>>, %arg6: memref<8x4xf32, #tpu.memory_space<vmem>>, %arg7: memref<1x8x288xf32, #tpu.memory_space<vmem>>) attributes {dimension_semantics = [#tpu.dimension_semantics<parallel>, #tpu.dimension_semantics<parallel>], iteration_bounds = array<i64: 2, 2>, scalar_prefetch = 0 : i64, scratch_operands = 0 : i64, tpu.core_type = #tpu.core_type<tc>, window_params = [{transform_indices = @transform_0, window_bounds = array<i64: 1, 8, 384>}, {transform_indices = @transform_1, window_bounds = array<i64: 8, 36>}, {transform_indices = @transform_2, window_bounds = array<i64: 8, 4>}, {transform_indices = @transform_3, window_bounds = array<i64: 8, 36>}, {transform_indices = @transform_4, window_bounds = array<i64: 8, 4>}, {transform_indices = @transform_5, window_bounds = array<i64: 1, 8, 288>}]} {
    %c0 = arith.constant 0 : index
    %c0_0 = arith.constant 0 : index
    %0 = vector.load %arg3[%c0, %c0_0] : memref<8x36xf32, #tpu.memory_space<vmem>>, vector<8x36xf32>
    %c0_1 = arith.constant 0 : index
    %c0_2 = arith.constant 0 : index
    %1 = vector.load %arg5[%c0_1, %c0_2] : memref<8x36xf32, #tpu.memory_space<vmem>>, vector<8x36xf32>
    %c0_3 = arith.constant 0 : index
    %c0_4 = arith.constant 0 : index
    %2 = vector.load %arg4[%c0_3, %c0_4] : memref<8x4xf32, #tpu.memory_space<vmem>>, vector<8x4xf32>
    %c0_5 = arith.constant 0 : index
    %c0_6 = arith.constant 0 : index
    %3 = vector.load %arg6[%c0_5, %c0_6] : memref<8x4xf32, #tpu.memory_space<vmem>>, vector<8x4xf32>
    %c0_7 = arith.constant 0 : index
    %c0_8 = arith.constant 0 : index
    %c0_9 = arith.constant 0 : index
    %4 = vector.load %arg2[%c0_7, %c0_8, %c0_9] : memref<1x8x384xf32, #tpu.memory_space<vmem>>, vector<1x8x288xf32>
    %5 = vector.shape_cast %4 : vector<1x8x288xf32> to vector<8x288xf32>
    %c0_10 = arith.constant 0 : index
    %c0_11 = arith.constant 0 : index
    %c1 = arith.constant 1 : index
    %6 = vector.load %arg2[%c0_10, %c0_11, %c1] : memref<1x8x384xf32, #tpu.memory_space<vmem>>, vector<1x8x288xf32>
    %7 = vector.shape_cast %6 : vector<1x8x288xf32> to vector<8x288xf32>
    %c0_12 = arith.constant 0 : index
    %c0_13 = arith.constant 0 : index
    %c2 = arith.constant 2 : index
    %8 = vector.load %arg2[%c0_12, %c0_13, %c2] : memref<1x8x384xf32, #tpu.memory_space<vmem>>, vector<1x8x288xf32>
    %9 = vector.shape_cast %8 : vector<1x8x288xf32> to vector<8x288xf32>
    %c0_14 = arith.constant 0 : index
    %c0_15 = arith.constant 0 : index
    %c18 = arith.constant 18 : index
    %10 = vector.load %arg2[%c0_14, %c0_15, %c18] : memref<1x8x384xf32, #tpu.memory_space<vmem>>, vector<1x8x288xf32>
    %11 = vector.shape_cast %10 : vector<1x8x288xf32> to vector<8x288xf32>
    %c0_16 = arith.constant 0 : index
    %c0_17 = arith.constant 0 : index
    %c19 = arith.constant 19 : index
    %12 = vector.load %arg2[%c0_16, %c0_17, %c19] : memref<1x8x384xf32, #tpu.memory_space<vmem>>, vector<1x8x288xf32>
    %13 = vector.shape_cast %12 : vector<1x8x288xf32> to vector<8x288xf32>
    %c0_18 = arith.constant 0 : index
    %c0_19 = arith.constant 0 : index
    %c20 = arith.constant 20 : index
    %14 = vector.load %arg2[%c0_18, %c0_19, %c20] : memref<1x8x384xf32, #tpu.memory_space<vmem>>, vector<1x8x288xf32>
    %15 = vector.shape_cast %14 : vector<1x8x288xf32> to vector<8x288xf32>
    %c0_20 = arith.constant 0 : index
    %c0_21 = arith.constant 0 : index
    %c36 = arith.constant 36 : index
    %16 = vector.load %arg2[%c0_20, %c0_21, %c36] : memref<1x8x384xf32, #tpu.memory_space<vmem>>, vector<1x8x288xf32>
    %17 = vector.shape_cast %16 : vector<1x8x288xf32> to vector<8x288xf32>
    %c0_22 = arith.constant 0 : index
    %c0_23 = arith.constant 0 : index
    %c37 = arith.constant 37 : index
    %18 = vector.load %arg2[%c0_22, %c0_23, %c37] : memref<1x8x384xf32, #tpu.memory_space<vmem>>, vector<1x8x288xf32>
    %19 = vector.shape_cast %18 : vector<1x8x288xf32> to vector<8x288xf32>
    %c0_24 = arith.constant 0 : index
    %c0_25 = arith.constant 0 : index
    %c38 = arith.constant 38 : index
    %20 = vector.load %arg2[%c0_24, %c0_25, %c38] : memref<1x8x384xf32, #tpu.memory_space<vmem>>, vector<1x8x288xf32>
    %21 = vector.shape_cast %20 : vector<1x8x288xf32> to vector<8x288xf32>
    %22 = vector.extract_strided_slice %0 {offsets = [0, 0], sizes = [8, 1], strides = [1, 1]} : vector<8x36xf32> to vector<8x1xf32>
    %23 = vector.broadcast %22 : vector<8x1xf32> to vector<8x288xf32>
    %24 = arith.mulf %23, %5 : vector<8x288xf32>
    %25 = vector.extract_strided_slice %2 {offsets = [0, 0], sizes = [8, 1], strides = [1, 1]} : vector<8x4xf32> to vector<8x1xf32>
    %26 = vector.broadcast %25 : vector<8x1xf32> to vector<8x288xf32>
    %27 = arith.addf %24, %26 : vector<8x288xf32>
    %28 = vector.extract_strided_slice %1 {offsets = [0, 0], sizes = [8, 1], strides = [1, 1]} : vector<8x36xf32> to vector<8x1xf32>
    %29 = vector.broadcast %28 : vector<8x1xf32> to vector<8x288xf32>
    %30 = arith.mulf %29, %5 : vector<8x288xf32>
    %31 = vector.extract_strided_slice %3 {offsets = [0, 0], sizes = [8, 1], strides = [1, 1]} : vector<8x4xf32> to vector<8x1xf32>
    %32 = vector.broadcast %31 : vector<8x1xf32> to vector<8x288xf32>
    %33 = arith.addf %30, %32 : vector<8x288xf32>
    %34 = vector.extract_strided_slice %0 {offsets = [0, 1], sizes = [8, 1], strides = [1, 1]} : vector<8x36xf32> to vector<8x1xf32>
    %35 = vector.broadcast %34 : vector<8x1xf32> to vector<8x288xf32>
    %36 = arith.mulf %35, %7 : vector<8x288xf32>
    %37 = arith.addf %27, %36 : vector<8x288xf32>
    %38 = vector.extract_strided_slice %1 {offsets = [0, 1], sizes = [8, 1], strides = [1, 1]} : vector<8x36xf32> to vector<8x1xf32>
    %39 = vector.broadcast %38 : vector<8x1xf32> to vector<8x288xf32>
    %40 = arith.mulf %39, %7 : vector<8x288xf32>
    %41 = arith.addf %33, %40 : vector<8x288xf32>
    %42 = vector.extract_strided_slice %0 {offsets = [0, 2], sizes = [8, 1], strides = [1, 1]} : vector<8x36xf32> to vector<8x1xf32>
    %43 = vector.broadcast %42 : vector<8x1xf32> to vector<8x288xf32>
    %44 = arith.mulf %43, %9 : vector<8x288xf32>
    %45 = arith.addf %37, %44 : vector<8x288xf32>
    %46 = vector.extract_strided_slice %1 {offsets = [0, 2], sizes = [8, 1], strides = [1, 1]} : vector<8x36xf32> to vector<8x1xf32>
    %47 = vector.broadcast %46 : vector<8x1xf32> to vector<8x288xf32>
    %48 = arith.mulf %47, %9 : vector<8x288xf32>
    %49 = arith.addf %41, %48 : vector<8x288xf32>
    %50 = vector.extract_strided_slice %0 {offsets = [0, 3], sizes = [8, 1], strides = [1, 1]} : vector<8x36xf32> to vector<8x1xf32>
    %51 = vector.broadcast %50 : vector<8x1xf32> to vector<8x288xf32>
    %52 = arith.mulf %51, %11 : vector<8x288xf32>
    %53 = arith.addf %45, %52 : vector<8x288xf32>
    %54 = vector.extract_strided_slice %1 {offsets = [0, 3], sizes = [8, 1], strides = [1, 1]} : vector<8x36xf32> to vector<8x1xf32>
    %55 = vector.broadcast %54 : vector<8x1xf32> to vector<8x288xf32>
    %56 = arith.mulf %55, %11 : vector<8x288xf32>
    %57 = arith.addf %49, %56 : vector<8x288xf32>
    %58 = vector.extract_strided_slice %0 {offsets = [0, 4], sizes = [8, 1], strides = [1, 1]} : vector<8x36xf32> to vector<8x1xf32>
    %59 = vector.broadcast %58 : vector<8x1xf32> to vector<8x288xf32>
    %60 = arith.mulf %59, %13 : vector<8x288xf32>
    %61 = arith.addf %53, %60 : vector<8x288xf32>
    %62 = vector.extract_strided_slice %1 {offsets = [0, 4], sizes = [8, 1], strides = [1, 1]} : vector<8x36xf32> to vector<8x1xf32>
    %63 = vector.broadcast %62 : vector<8x1xf32> to vector<8x288xf32>
    %64 = arith.mulf %63, %13 : vector<8x288xf32>
    %65 = arith.addf %57, %64 : vector<8x288xf32>
    %66 = vector.extract_strided_slice %0 {offsets = [0, 5], sizes = [8, 1], strides = [1, 1]} : vector<8x36xf32> to vector<8x1xf32>
    %67 = vector.broadcast %66 : vector<8x1xf32> to vector<8x288xf32>
    %68 = arith.mulf %67, %15 : vector<8x288xf32>
    %69 = arith.addf %61, %68 : vector<8x288xf32>
    %70 = vector.extract_strided_slice %1 {offsets = [0, 5], sizes = [8, 1], strides = [1, 1]} : vector<8x36xf32> to vector<8x1xf32>
    %71 = vector.broadcast %70 : vector<8x1xf32> to vector<8x288xf32>
    %72 = arith.mulf %71, %15 : vector<8x288xf32>
    %73 = arith.addf %65, %72 : vector<8x288xf32>
    %74 = vector.extract_strided_slice %0 {offsets = [0, 6], sizes = [8, 1], strides = [1, 1]} : vector<8x36xf32> to vector<8x1xf32>
    %75 = vector.broadcast %74 : vector<8x1xf32> to vector<8x288xf32>
    %76 = arith.mulf %75, %17 : vector<8x288xf32>
    %77 = arith.addf %69, %76 : vector<8x288xf32>
    %78 = vector.extract_strided_slice %1 {offsets = [0, 6], sizes = [8, 1], strides = [1, 1]} : vector<8x36xf32> to vector<8x1xf32>
    %79 = vector.broadcast %78 : vector<8x1xf32> to vector<8x288xf32>
    %80 = arith.mulf %79, %17 : vector<8x288xf32>
    %81 = arith.addf %73, %80 : vector<8x288xf32>
    %82 = vector.extract_strided_slice %0 {offsets = [0, 7], sizes = [8, 1], strides = [1, 1]} : vector<8x36xf32> to vector<8x1xf32>
    %83 = vector.broadcast %82 : vector<8x1xf32> to vector<8x288xf32>
    %84 = arith.mulf %83, %19 : vector<8x288xf32>
    %85 = arith.addf %77, %84 : vector<8x288xf32>
    %86 = vector.extract_strided_slice %1 {offsets = [0, 7], sizes = [8, 1], strides = [1, 1]} : vector<8x36xf32> to vector<8x1xf32>
    %87 = vector.broadcast %86 : vector<8x1xf32> to vector<8x288xf32>
    %88 = arith.mulf %87, %19 : vector<8x288xf32>
    %89 = arith.addf %81, %88 : vector<8x288xf32>
    %90 = vector.extract_strided_slice %0 {offsets = [0, 8], sizes = [8, 1], strides = [1, 1]} : vector<8x36xf32> to vector<8x1xf32>
    %91 = vector.broadcast %90 : vector<8x1xf32> to vector<8x288xf32>
    %92 = arith.mulf %91, %21 : vector<8x288xf32>
    %93 = arith.addf %85, %92 : vector<8x288xf32>
    %94 = vector.extract_strided_slice %1 {offsets = [0, 8], sizes = [8, 1], strides = [1, 1]} : vector<8x36xf32> to vector<8x1xf32>
    %95 = vector.broadcast %94 : vector<8x1xf32> to vector<8x288xf32>
    %96 = arith.mulf %95, %21 : vector<8x288xf32>
    %97 = arith.addf %89, %96 : vector<8x288xf32>
    %98 = vector.extract_strided_slice %0 {offsets = [0, 9], sizes = [8, 1], strides = [1, 1]} : vector<8x36xf32> to vector<8x1xf32>
    %99 = vector.broadcast %98 : vector<8x1xf32> to vector<8x288xf32>
    %100 = arith.mulf %99, %5 : vector<8x288xf32>
    %101 = vector.extract_strided_slice %2 {offsets = [0, 1], sizes = [8, 1], strides = [1, 1]} : vector<8x4xf32> to vector<8x1xf32>
    %102 = vector.broadcast %101 : vector<8x1xf32> to vector<8x288xf32>
    %103 = arith.addf %100, %102 : vector<8x288xf32>
    %104 = vector.extract_strided_slice %1 {offsets = [0, 9], sizes = [8, 1], strides = [1, 1]} : vector<8x36xf32> to vector<8x1xf32>
    %105 = vector.broadcast %104 : vector<8x1xf32> to vector<8x288xf32>
    %106 = arith.mulf %105, %5 : vector<8x288xf32>
    %107 = vector.extract_strided_slice %3 {offsets = [0, 1], sizes = [8, 1], strides = [1, 1]} : vector<8x4xf32> to vector<8x1xf32>
    %108 = vector.broadcast %107 : vector<8x1xf32> to vector<8x288xf32>
    %109 = arith.addf %106, %108 : vector<8x288xf32>
    %110 = vector.extract_strided_slice %0 {offsets = [0, 10], sizes = [8, 1], strides = [1, 1]} : vector<8x36xf32> to vector<8x1xf32>
    %111 = vector.broadcast %110 : vector<8x1xf32> to vector<8x288xf32>
    %112 = arith.mulf %111, %7 : vector<8x288xf32>
    %113 = arith.addf %103, %112 : vector<8x288xf32>
    %114 = vector.extract_strided_slice %1 {offsets = [0, 10], sizes = [8, 1], strides = [1, 1]} : vector<8x36xf32> to vector<8x1xf32>
    %115 = vector.broadcast %114 : vector<8x1xf32> to vector<8x288xf32>
    %116 = arith.mulf %115, %7 : vector<8x288xf32>
    %117 = arith.addf %109, %116 : vector<8x288xf32>
    %118 = vector.extract_strided_slice %0 {offsets = [0, 11], sizes = [8, 1], strides = [1, 1]} : vector<8x36xf32> to vector<8x1xf32>
    %119 = vector.broadcast %118 : vector<8x1xf32> to vector<8x288xf32>
    %120 = arith.mulf %119, %9 : vector<8x288xf32>
    %121 = arith.addf %113, %120 : vector<8x288xf32>
    %122 = vector.extract_strided_slice %1 {offsets = [0, 11], sizes = [8, 1], strides = [1, 1]} : vector<8x36xf32> to vector<8x1xf32>
    %123 = vector.broadcast %122 : vector<8x1xf32> to vector<8x288xf32>
    %124 = arith.mulf %123, %9 : vector<8x288xf32>
    %125 = arith.addf %117, %124 : vector<8x288xf32>
    %126 = vector.extract_strided_slice %0 {offsets = [0, 12], sizes = [8, 1], strides = [1, 1]} : vector<8x36xf32> to vector<8x1xf32>
    %127 = vector.broadcast %126 : vector<8x1xf32> to vector<8x288xf32>
    %128 = arith.mulf %127, %11 : vector<8x288xf32>
    %129 = arith.addf %121, %128 : vector<8x288xf32>
    %130 = vector.extract_strided_slice %1 {offsets = [0, 12], sizes = [8, 1], strides = [1, 1]} : vector<8x36xf32> to vector<8x1xf32>
    %131 = vector.broadcast %130 : vector<8x1xf32> to vector<8x288xf32>
    %132 = arith.mulf %131, %11 : vector<8x288xf32>
    %133 = arith.addf %125, %132 : vector<8x288xf32>
    %134 = vector.extract_strided_slice %0 {offsets = [0, 13], sizes = [8, 1], strides = [1, 1]} : vector<8x36xf32> to vector<8x1xf32>
    %135 = vector.broadcast %134 : vector<8x1xf32> to vector<8x288xf32>
    %136 = arith.mulf %135, %13 : vector<8x288xf32>
    %137 = arith.addf %129, %136 : vector<8x288xf32>
    %138 = vector.extract_strided_slice %1 {offsets = [0, 13], sizes = [8, 1], strides = [1, 1]} : vector<8x36xf32> to vector<8x1xf32>
    %139 = vector.broadcast %138 : vector<8x1xf32> to vector<8x288xf32>
    %140 = arith.mulf %139, %13 : vector<8x288xf32>
    %141 = arith.addf %133, %140 : vector<8x288xf32>
    %142 = vector.extract_strided_slice %0 {offsets = [0, 14], sizes = [8, 1], strides = [1, 1]} : vector<8x36xf32> to vector<8x1xf32>
    %143 = vector.broadcast %142 : vector<8x1xf32> to vector<8x288xf32>
    %144 = arith.mulf %143, %15 : vector<8x288xf32>
    %145 = arith.addf %137, %144 : vector<8x288xf32>
    %146 = vector.extract_strided_slice %1 {offsets = [0, 14], sizes = [8, 1], strides = [1, 1]} : vector<8x36xf32> to vector<8x1xf32>
    %147 = vector.broadcast %146 : vector<8x1xf32> to vector<8x288xf32>
    %148 = arith.mulf %147, %15 : vector<8x288xf32>
    %149 = arith.addf %141, %148 : vector<8x288xf32>
    %150 = vector.extract_strided_slice %0 {offsets = [0, 15], sizes = [8, 1], strides = [1, 1]} : vector<8x36xf32> to vector<8x1xf32>
    %151 = vector.broadcast %150 : vector<8x1xf32> to vector<8x288xf32>
    %152 = arith.mulf %151, %17 : vector<8x288xf32>
    %153 = arith.addf %145, %152 : vector<8x288xf32>
    %154 = vector.extract_strided_slice %1 {offsets = [0, 15], sizes = [8, 1], strides = [1, 1]} : vector<8x36xf32> to vector<8x1xf32>
    %155 = vector.broadcast %154 : vector<8x1xf32> to vector<8x288xf32>
    %156 = arith.mulf %155, %17 : vector<8x288xf32>
    %157 = arith.addf %149, %156 : vector<8x288xf32>
    %158 = vector.extract_strided_slice %0 {offsets = [0, 16], sizes = [8, 1], strides = [1, 1]} : vector<8x36xf32> to vector<8x1xf32>
    %159 = vector.broadcast %158 : vector<8x1xf32> to vector<8x288xf32>
    %160 = arith.mulf %159, %19 : vector<8x288xf32>
    %161 = arith.addf %153, %160 : vector<8x288xf32>
    %162 = vector.extract_strided_slice %1 {offsets = [0, 16], sizes = [8, 1], strides = [1, 1]} : vector<8x36xf32> to vector<8x1xf32>
    %163 = vector.broadcast %162 : vector<8x1xf32> to vector<8x288xf32>
    %164 = arith.mulf %163, %19 : vector<8x288xf32>
    %165 = arith.addf %157, %164 : vector<8x288xf32>
    %166 = vector.extract_strided_slice %0 {offsets = [0, 17], sizes = [8, 1], strides = [1, 1]} : vector<8x36xf32> to vector<8x1xf32>
    %167 = vector.broadcast %166 : vector<8x1xf32> to vector<8x288xf32>
    %168 = arith.mulf %167, %21 : vector<8x288xf32>
    %169 = arith.addf %161, %168 : vector<8x288xf32>
    %170 = vector.extract_strided_slice %1 {offsets = [0, 17], sizes = [8, 1], strides = [1, 1]} : vector<8x36xf32> to vector<8x1xf32>
    %171 = vector.broadcast %170 : vector<8x1xf32> to vector<8x288xf32>
    %172 = arith.mulf %171, %21 : vector<8x288xf32>
    %173 = arith.addf %165, %172 : vector<8x288xf32>
    %174 = arith.maximumf %93, %169 : vector<8x288xf32>
    %175 = arith.maximumf %97, %173 : vector<8x288xf32>
    %176 = vector.extract_strided_slice %0 {offsets = [0, 18], sizes = [8, 1], strides = [1, 1]} : vector<8x36xf32> to vector<8x1xf32>
    %177 = vector.broadcast %176 : vector<8x1xf32> to vector<8x288xf32>
    %178 = arith.mulf %177, %5 : vector<8x288xf32>
    %179 = vector.extract_strided_slice %2 {offsets = [0, 2], sizes = [8, 1], strides = [1, 1]} : vector<8x4xf32> to vector<8x1xf32>
    %180 = vector.broadcast %179 : vector<8x1xf32> to vector<8x288xf32>
    %181 = arith.addf %178, %180 : vector<8x288xf32>
    %182 = vector.extract_strided_slice %1 {offsets = [0, 18], sizes = [8, 1], strides = [1, 1]} : vector<8x36xf32> to vector<8x1xf32>
    %183 = vector.broadcast %182 : vector<8x1xf32> to vector<8x288xf32>
    %184 = arith.mulf %183, %5 : vector<8x288xf32>
    %185 = vector.extract_strided_slice %3 {offsets = [0, 2], sizes = [8, 1], strides = [1, 1]} : vector<8x4xf32> to vector<8x1xf32>
    %186 = vector.broadcast %185 : vector<8x1xf32> to vector<8x288xf32>
    %187 = arith.addf %184, %186 : vector<8x288xf32>
    %188 = vector.extract_strided_slice %0 {offsets = [0, 19], sizes = [8, 1], strides = [1, 1]} : vector<8x36xf32> to vector<8x1xf32>
    %189 = vector.broadcast %188 : vector<8x1xf32> to vector<8x288xf32>
    %190 = arith.mulf %189, %7 : vector<8x288xf32>
    %191 = arith.addf %181, %190 : vector<8x288xf32>
    %192 = vector.extract_strided_slice %1 {offsets = [0, 19], sizes = [8, 1], strides = [1, 1]} : vector<8x36xf32> to vector<8x1xf32>
    %193 = vector.broadcast %192 : vector<8x1xf32> to vector<8x288xf32>
    %194 = arith.mulf %193, %7 : vector<8x288xf32>
    %195 = arith.addf %187, %194 : vector<8x288xf32>
    %196 = vector.extract_strided_slice %0 {offsets = [0, 20], sizes = [8, 1], strides = [1, 1]} : vector<8x36xf32> to vector<8x1xf32>
    %197 = vector.broadcast %196 : vector<8x1xf32> to vector<8x288xf32>
    %198 = arith.mulf %197, %9 : vector<8x288xf32>
    %199 = arith.addf %191, %198 : vector<8x288xf32>
    %200 = vector.extract_strided_slice %1 {offsets = [0, 20], sizes = [8, 1], strides = [1, 1]} : vector<8x36xf32> to vector<8x1xf32>
    %201 = vector.broadcast %200 : vector<8x1xf32> to vector<8x288xf32>
    %202 = arith.mulf %201, %9 : vector<8x288xf32>
    %203 = arith.addf %195, %202 : vector<8x288xf32>
    %204 = vector.extract_strided_slice %0 {offsets = [0, 21], sizes = [8, 1], strides = [1, 1]} : vector<8x36xf32> to vector<8x1xf32>
    %205 = vector.broadcast %204 : vector<8x1xf32> to vector<8x288xf32>
    %206 = arith.mulf %205, %11 : vector<8x288xf32>
    %207 = arith.addf %199, %206 : vector<8x288xf32>
    %208 = vector.extract_strided_slice %1 {offsets = [0, 21], sizes = [8, 1], strides = [1, 1]} : vector<8x36xf32> to vector<8x1xf32>
    %209 = vector.broadcast %208 : vector<8x1xf32> to vector<8x288xf32>
    %210 = arith.mulf %209, %11 : vector<8x288xf32>
    %211 = arith.addf %203, %210 : vector<8x288xf32>
    %212 = vector.extract_strided_slice %0 {offsets = [0, 22], sizes = [8, 1], strides = [1, 1]} : vector<8x36xf32> to vector<8x1xf32>
    %213 = vector.broadcast %212 : vector<8x1xf32> to vector<8x288xf32>
    %214 = arith.mulf %213, %13 : vector<8x288xf32>
    %215 = arith.addf %207, %214 : vector<8x288xf32>
    %216 = vector.extract_strided_slice %1 {offsets = [0, 22], sizes = [8, 1], strides = [1, 1]} : vector<8x36xf32> to vector<8x1xf32>
    %217 = vector.broadcast %216 : vector<8x1xf32> to vector<8x288xf32>
    %218 = arith.mulf %217, %13 : vector<8x288xf32>
    %219 = arith.addf %211, %218 : vector<8x288xf32>
    %220 = vector.extract_strided_slice %0 {offsets = [0, 23], sizes = [8, 1], strides = [1, 1]} : vector<8x36xf32> to vector<8x1xf32>
    %221 = vector.broadcast %220 : vector<8x1xf32> to vector<8x288xf32>
    %222 = arith.mulf %221, %15 : vector<8x288xf32>
    %223 = arith.addf %215, %222 : vector<8x288xf32>
    %224 = vector.extract_strided_slice %1 {offsets = [0, 23], sizes = [8, 1], strides = [1, 1]} : vector<8x36xf32> to vector<8x1xf32>
    %225 = vector.broadcast %224 : vector<8x1xf32> to vector<8x288xf32>
    %226 = arith.mulf %225, %15 : vector<8x288xf32>
    %227 = arith.addf %219, %226 : vector<8x288xf32>
    %228 = vector.extract_strided_slice %0 {offsets = [0, 24], sizes = [8, 1], strides = [1, 1]} : vector<8x36xf32> to vector<8x1xf32>
    %229 = vector.broadcast %228 : vector<8x1xf32> to vector<8x288xf32>
    %230 = arith.mulf %229, %17 : vector<8x288xf32>
    %231 = arith.addf %223, %230 : vector<8x288xf32>
    %232 = vector.extract_strided_slice %1 {offsets = [0, 24], sizes = [8, 1], strides = [1, 1]} : vector<8x36xf32> to vector<8x1xf32>
    %233 = vector.broadcast %232 : vector<8x1xf32> to vector<8x288xf32>
    %234 = arith.mulf %233, %17 : vector<8x288xf32>
    %235 = arith.addf %227, %234 : vector<8x288xf32>
    %236 = vector.extract_strided_slice %0 {offsets = [0, 25], sizes = [8, 1], strides = [1, 1]} : vector<8x36xf32> to vector<8x1xf32>
    %237 = vector.broadcast %236 : vector<8x1xf32> to vector<8x288xf32>
    %238 = arith.mulf %237, %19 : vector<8x288xf32>
    %239 = arith.addf %231, %238 : vector<8x288xf32>
    %240 = vector.extract_strided_slice %1 {offsets = [0, 25], sizes = [8, 1], strides = [1, 1]} : vector<8x36xf32> to vector<8x1xf32>
    %241 = vector.broadcast %240 : vector<8x1xf32> to vector<8x288xf32>
    %242 = arith.mulf %241, %19 : vector<8x288xf32>
    %243 = arith.addf %235, %242 : vector<8x288xf32>
    %244 = vector.extract_strided_slice %0 {offsets = [0, 26], sizes = [8, 1], strides = [1, 1]} : vector<8x36xf32> to vector<8x1xf32>
    %245 = vector.broadcast %244 : vector<8x1xf32> to vector<8x288xf32>
    %246 = arith.mulf %245, %21 : vector<8x288xf32>
    %247 = arith.addf %239, %246 : vector<8x288xf32>
    %248 = vector.extract_strided_slice %1 {offsets = [0, 26], sizes = [8, 1], strides = [1, 1]} : vector<8x36xf32> to vector<8x1xf32>
    %249 = vector.broadcast %248 : vector<8x1xf32> to vector<8x288xf32>
    %250 = arith.mulf %249, %21 : vector<8x288xf32>
    %251 = arith.addf %243, %250 : vector<8x288xf32>
    %252 = arith.maximumf %174, %247 : vector<8x288xf32>
    %253 = arith.maximumf %175, %251 : vector<8x288xf32>
    %254 = vector.extract_strided_slice %0 {offsets = [0, 27], sizes = [8, 1], strides = [1, 1]} : vector<8x36xf32> to vector<8x1xf32>
    %255 = vector.broadcast %254 : vector<8x1xf32> to vector<8x288xf32>
    %256 = arith.mulf %255, %5 : vector<8x288xf32>
    %257 = vector.extract_strided_slice %2 {offsets = [0, 3], sizes = [8, 1], strides = [1, 1]} : vector<8x4xf32> to vector<8x1xf32>
    %258 = vector.broadcast %257 : vector<8x1xf32> to vector<8x288xf32>
    %259 = arith.addf %256, %258 : vector<8x288xf32>
    %260 = vector.extract_strided_slice %1 {offsets = [0, 27], sizes = [8, 1], strides = [1, 1]} : vector<8x36xf32> to vector<8x1xf32>
    %261 = vector.broadcast %260 : vector<8x1xf32> to vector<8x288xf32>
    %262 = arith.mulf %261, %5 : vector<8x288xf32>
    %263 = vector.extract_strided_slice %3 {offsets = [0, 3], sizes = [8, 1], strides = [1, 1]} : vector<8x4xf32> to vector<8x1xf32>
    %264 = vector.broadcast %263 : vector<8x1xf32> to vector<8x288xf32>
    %265 = arith.addf %262, %264 : vector<8x288xf32>
    %266 = vector.extract_strided_slice %0 {offsets = [0, 28], sizes = [8, 1], strides = [1, 1]} : vector<8x36xf32> to vector<8x1xf32>
    %267 = vector.broadcast %266 : vector<8x1xf32> to vector<8x288xf32>
    %268 = arith.mulf %267, %7 : vector<8x288xf32>
    %269 = arith.addf %259, %268 : vector<8x288xf32>
    %270 = vector.extract_strided_slice %1 {offsets = [0, 28], sizes = [8, 1], strides = [1, 1]} : vector<8x36xf32> to vector<8x1xf32>
    %271 = vector.broadcast %270 : vector<8x1xf32> to vector<8x288xf32>
    %272 = arith.mulf %271, %7 : vector<8x288xf32>
    %273 = arith.addf %265, %272 : vector<8x288xf32>
    %274 = vector.extract_strided_slice %0 {offsets = [0, 29], sizes = [8, 1], strides = [1, 1]} : vector<8x36xf32> to vector<8x1xf32>
    %275 = vector.broadcast %274 : vector<8x1xf32> to vector<8x288xf32>
    %276 = arith.mulf %275, %9 : vector<8x288xf32>
    %277 = arith.addf %269, %276 : vector<8x288xf32>
    %278 = vector.extract_strided_slice %1 {offsets = [0, 29], sizes = [8, 1], strides = [1, 1]} : vector<8x36xf32> to vector<8x1xf32>
    %279 = vector.broadcast %278 : vector<8x1xf32> to vector<8x288xf32>
    %280 = arith.mulf %279, %9 : vector<8x288xf32>
    %281 = arith.addf %273, %280 : vector<8x288xf32>
    %282 = vector.extract_strided_slice %0 {offsets = [0, 30], sizes = [8, 1], strides = [1, 1]} : vector<8x36xf32> to vector<8x1xf32>
    %283 = vector.broadcast %282 : vector<8x1xf32> to vector<8x288xf32>
    %284 = arith.mulf %283, %11 : vector<8x288xf32>
    %285 = arith.addf %277, %284 : vector<8x288xf32>
    %286 = vector.extract_strided_slice %1 {offsets = [0, 30], sizes = [8, 1], strides = [1, 1]} : vector<8x36xf32> to vector<8x1xf32>
    %287 = vector.broadcast %286 : vector<8x1xf32> to vector<8x288xf32>
    %288 = arith.mulf %287, %11 : vector<8x288xf32>
    %289 = arith.addf %281, %288 : vector<8x288xf32>
    %290 = vector.extract_strided_slice %0 {offsets = [0, 31], sizes = [8, 1], strides = [1, 1]} : vector<8x36xf32> to vector<8x1xf32>
    %291 = vector.broadcast %290 : vector<8x1xf32> to vector<8x288xf32>
    %292 = arith.mulf %291, %13 : vector<8x288xf32>
    %293 = arith.addf %285, %292 : vector<8x288xf32>
    %294 = vector.extract_strided_slice %1 {offsets = [0, 31], sizes = [8, 1], strides = [1, 1]} : vector<8x36xf32> to vector<8x1xf32>
    %295 = vector.broadcast %294 : vector<8x1xf32> to vector<8x288xf32>
    %296 = arith.mulf %295, %13 : vector<8x288xf32>
    %297 = arith.addf %289, %296 : vector<8x288xf32>
    %298 = vector.extract_strided_slice %0 {offsets = [0, 32], sizes = [8, 1], strides = [1, 1]} : vector<8x36xf32> to vector<8x1xf32>
    %299 = vector.broadcast %298 : vector<8x1xf32> to vector<8x288xf32>
    %300 = arith.mulf %299, %15 : vector<8x288xf32>
    %301 = arith.addf %293, %300 : vector<8x288xf32>
    %302 = vector.extract_strided_slice %1 {offsets = [0, 32], sizes = [8, 1], strides = [1, 1]} : vector<8x36xf32> to vector<8x1xf32>
    %303 = vector.broadcast %302 : vector<8x1xf32> to vector<8x288xf32>
    %304 = arith.mulf %303, %15 : vector<8x288xf32>
    %305 = arith.addf %297, %304 : vector<8x288xf32>
    %306 = vector.extract_strided_slice %0 {offsets = [0, 33], sizes = [8, 1], strides = [1, 1]} : vector<8x36xf32> to vector<8x1xf32>
    %307 = vector.broadcast %306 : vector<8x1xf32> to vector<8x288xf32>
    %308 = arith.mulf %307, %17 : vector<8x288xf32>
    %309 = arith.addf %301, %308 : vector<8x288xf32>
    %310 = vector.extract_strided_slice %1 {offsets = [0, 33], sizes = [8, 1], strides = [1, 1]} : vector<8x36xf32> to vector<8x1xf32>
    %311 = vector.broadcast %310 : vector<8x1xf32> to vector<8x288xf32>
    %312 = arith.mulf %311, %17 : vector<8x288xf32>
    %313 = arith.addf %305, %312 : vector<8x288xf32>
    %314 = vector.extract_strided_slice %0 {offsets = [0, 34], sizes = [8, 1], strides = [1, 1]} : vector<8x36xf32> to vector<8x1xf32>
    %315 = vector.broadcast %314 : vector<8x1xf32> to vector<8x288xf32>
    %316 = arith.mulf %315, %19 : vector<8x288xf32>
    %317 = arith.addf %309, %316 : vector<8x288xf32>
    %318 = vector.extract_strided_slice %1 {offsets = [0, 34], sizes = [8, 1], strides = [1, 1]} : vector<8x36xf32> to vector<8x1xf32>
    %319 = vector.broadcast %318 : vector<8x1xf32> to vector<8x288xf32>
    %320 = arith.mulf %319, %19 : vector<8x288xf32>
    %321 = arith.addf %313, %320 : vector<8x288xf32>
    %322 = vector.extract_strided_slice %0 {offsets = [0, 35], sizes = [8, 1], strides = [1, 1]} : vector<8x36xf32> to vector<8x1xf32>
    %323 = vector.broadcast %322 : vector<8x1xf32> to vector<8x288xf32>
    %324 = arith.mulf %323, %21 : vector<8x288xf32>
    %325 = arith.addf %317, %324 : vector<8x288xf32>
    %326 = vector.extract_strided_slice %1 {offsets = [0, 35], sizes = [8, 1], strides = [1, 1]} : vector<8x36xf32> to vector<8x1xf32>
    %327 = vector.broadcast %326 : vector<8x1xf32> to vector<8x288xf32>
    %328 = arith.mulf %327, %21 : vector<8x288xf32>
    %329 = arith.addf %321, %328 : vector<8x288xf32>
    %330 = arith.maximumf %252, %325 : vector<8x288xf32>
    %331 = arith.maximumf %253, %329 : vector<8x288xf32>
    %332 = arith.subf %330, %331 : vector<8x288xf32>
    %c0_26 = arith.constant 0 : index
    %c0_27 = arith.constant 0 : index
    %c0_28 = arith.constant 0 : index
    %333 = vector.load %arg7[%c0_26, %c0_27, %c0_28] : memref<1x8x288xf32, #tpu.memory_space<vmem>>, vector<1x8x288xf32>
    %334 = vector.shape_cast %333 : vector<1x8x288xf32> to vector<8x288xf32>
    %335 = vector.shape_cast %332 : vector<8x288xf32> to vector<1x8x288xf32>
    tpu.vector_store %arg7[%c0_26, %c0_27, %c0_28], %335 {strides = array<i32>} : memref<1x8x288xf32, #tpu.memory_space<vmem>>, vector<1x8x288xf32>,
    return
  }
  func.func @transform_0(%arg0: i32, %arg1: i32) -> (i32, i32, i32) {
    %c0_i32 = arith.constant 0 : i32
    %c0_i32_0 = arith.constant 0 : i32
    return %arg0, %arg1, %c0_i32 : i32, i32, i32
  }
  func.func @transform_1(%arg0: i32, %arg1: i32) -> (i32, i32) {
    %c0_i32 = arith.constant 0 : i32
    %c0_i32_0 = arith.constant 0 : i32
    return %arg1, %c0_i32 : i32, i32
  }
  func.func @transform_2(%arg0: i32, %arg1: i32) -> (i32, i32) {
    %c0_i32 = arith.constant 0 : i32
    %c0_i32_0 = arith.constant 0 : i32
    return %arg1, %c0_i32 : i32, i32
  }
  func.func @transform_3(%arg0: i32, %arg1: i32) -> (i32, i32) {
    %c0_i32 = arith.constant 0 : i32
    %c0_i32_0 = arith.constant 0 : i32
    return %arg1, %c0_i32 : i32, i32
  }
  func.func @transform_4(%arg0: i32, %arg1: i32) -> (i32, i32) {
    %c0_i32 = arith.constant 0 : i32
    %c0_i32_0 = arith.constant 0 : i32
    return %arg1, %c0_i32 : i32, i32
  }
  func.func @transform_5(%arg0: i32, %arg1: i32) -> (i32, i32, i32) {
    %c0_i32 = arith.constant 0 : i32
    %c0_i32_0 = arith.constant 0 : i32
    return %arg0, %arg1, %c0_i32 : i32, i32, i32
  }
}

</mosaic_0001>

<bundles_post_ra>
// kernel: _lambda_.1
= control target key start
LH: loop header
LB: loop body
LE: loop exit
PB: predicated region body
PF: predicated region fallthrough
CT: control target
= control target key end

     0   :  { %s2462_s18 = smov 0   ;;  %s2464_s19 = smov 0   ;;  %s3868_s0 = inlined_call_operand.vmem [shape: f32[2,16,384], index: 0, kind: input, shape index: {}]   ;;  %s3869_s1 = inlined_call_operand.vmem [shape: f32[16,36], index: 1, kind: input, shape index: {}]   ;;  %s3870_s2 = inlined_call_operand.vmem [shape: f32[16,4], index: 2, kind: input, shape index: {}]   ;;  %s3871_s3 = inlined_call_operand.vmem [shape: f32[16,36], index: 3, kind: input, shape index: {}]   ;;  %s3872_s4 = inlined_call_operand.vmem [shape: f32[16,4], index: 4, kind: input, shape index: {}]   ;;  %s3873_s5 = inlined_call_operand.vmem [shape: f32[2,16,288], index: 5, kind: output, shape index: {}]  }
   0x1   :  { %s2466_s20 = smov 0   ;;  %s2468_s21 = smov 0  }
   0x2   :  { %s2470_s22 = smov 0  }
   0x3 LB: > { %s24_s23 = sadd.s32 1, %s2378_s20  ;;  %s27_s24 = sadd.s32 1, %s2382_s21  ;;  %s2386_s22 = sphi %s2470_s22, %s15_s22   ;;  %s2382_s21 = sphi %s2468_s21, %s4162_s21   ;;  %s2378_s20 = sphi %s2466_s20, %s4161_s20   ;;  %s2374_s19 = sphi %s2464_s19, %s4160_s19   ;;  %s2370_s18 = sphi %s2462_s18, %s4159_s18  }
   0x4   : > { %p25_p0 = scmp.ge.s32.totalorder %s24_s23, 2  ;;  %p2168_p1 = scmp.ge.s32.totalorder %s2386_s22, 1 }
   0x5   : > { %p243_p2 = scmp.lt.s32.totalorder %s2386_s22, 5 }
   0x6   : > { %s4164_s23 = smov (%p25_p0, %s24_s23), 0  ;;  %s4166_s24 = smov (!%p25_p0, %s27_s24), %s2382_s21 }
   0x7   : > { %p244_p3 = pnand %p2168_p1, %p243_p2  ;;  %p29_p4 = scmp.ge.s32.totalorder %s4166_s24, 2 }
   0x9   : > { %s4168_s24 = smov (%p29_p4, %s4166_s24), 0  ;;  %247 = sbr.rel (%p244_p3) target bundleno = 5900 (0x170c), region = 40 }
   0xe   : > { %p297_p5 = scmp.lt.s32.totalorder %s2370_s18, 1  ;;  %v2388_v0 = vmov 1   ;;  %v2389_v1 = vmov 0   ;;  %v3875_v6 = vmov 2   ;;  %v3874_v7 = vmov 3   ;;  %p295_p6 = scmp.lt.s32.totalorder %s2374_s19, 1 }
   0xf   : > { %2265 = vset.pattern.permute.xlu2 %v2388_v0  ;;  %2263 = vset.pattern.permute.xlu0 %v2389_v1  ;;  %v2392_v8 = vmov 4   ;;  %v2393_v9 = vmov 5   ;;  %v2396_v23 = vmov 6   ;;  %s2397_s27 = smov 110   ;;  %s2398_s29 = smov 109   ;;  %vm384_vm0 = vcmask 1039360  }
  0x10   : > { %s4170_s18 = smov (!%p297_p5, %s2370_s18), 1  ;;  %2264 = vset.pattern.permute.xlu1 %v2389_v1  ;;  %s4172_s19 = smov (!%p295_p6, %s2374_s19), 1  ;;  %vm433_vm1 = vcmask 1031168   ;;  %vm482_vm2 = vcmask 900096   ;;  %vm531_vm3 = vcmask 891904   ;;  %vm580_vm4 = vcmask 883712  }
  0x11   : > { %s2170_s25 = sshll.u32 %s4170_s18, 3  ;;  %s2177_s13 = smul.u32 3, %s4170_s18  ;;  %vm629_vm5 = vcmask 752640   ;;  %vm678_vm6 = vcmask 744448   ;;  %vm727_vm7 = vcmask 736256   ;;  %vm2019_vm8 = vcmask 261120  }
  0x12   : > { %s2500_s28 = scalar_lea.vmem %s3869_s1, %s2170_s25  ;;  %s2508_s6 = scalar_lea.vmem %s3871_s3, %s2170_s25 }
  0x13   : > { %v2503_v2 = vld [vmem:[%s2500_s28] sm:$0xff]  ;;  %s2519_s9 = scalar_lea.vmem %s3870_s2, %s2170_s25  ;;  %s2529_s12 = scalar_lea.vmem %s3872_s4, %s2170_s25 }
  0x14   : > { %369 = vperm.xlu2 %2265, %v2503_v2   ;;  %338 = vperm.xlu0 %2263, %v2503_v2   ;;  %v2513_v3 = vld [vmem:[%s2508_s6] sm:$0xff]  ;;  %s2178_s14 = smul.u32 6, %s4172_s19  ;;  %s2394_s18 = smov 127  }
  0x15   : > { %354 = vperm.xlu1 %2264, %v2513_v3   ;;  %v2522_v4 = vld [vmem:[%s2519_s9] sm:$0xff]  ;;  %s2395_s19 = smov 126   ;;  %s2399_s30 = smov 108  }
  0x16   : > { %v2532_v5 = vld [vmem:[%s2529_s12] sm:$0xff]  ;;  %s2550_s15 = sadd.s32 %s2178_s14, %s2177_s13  ;;  %s2400_s7 = smov 92  }
  0x17   : > { %s2169_s16 = sshll.u32 %s2550_s15, 3  ;;  %s2402_s8 = smov 91  }
  0x18   : > { %s2558_s26 = scalar_lea.vmem %s3868_s0, %s2169_s16  ;;  %s2404_s10 = smov 90  }
  0x19   : > { %v2561_v10 = vld [vmem:[%s2558_s26] sm:$0xff]  ;;  %v2564_v11 = vld [vmem:[%s2558_s26 + $0x8] sm:$0xff]  ;;  %v2567_v12 = vld [vmem:[%s2558_s26 + $0x10] sm:$0xff] }
  0x1c   : > { %394 = vperm.xlu2 %2265, %v2513_v3   ;;  %346 = vperm.xlu0 %2263, %v2522_v4  }
  0x1d   : > { %362 = vperm.xlu1 %2264, %v2532_v5  }
  0x24   : > { %2267 = vset.pattern.permute.xlu2 %v3875_v6  ;;  %2266 = vset.pattern.permute.xlu0 %v3875_v6 }
  0x25   : > { %443 = vperm.xlu2 %2267, %v2513_v3   ;;  %418 = vperm.xlu0 %2266, %v2503_v2  }
  0x26   : > { %2281 = vset.pattern.permute.xlu1 %v2388_v0 }
  0x2d   : > { %2269 = vset.pattern.permute.xlu2 %v3874_v7  ;;  %2268 = vset.pattern.permute.xlu0 %v3874_v7 }
  0x2e   : > { %492 = vperm.xlu2 %2269, %v2513_v3   ;;  %467 = vperm.xlu0 %2268, %v2503_v2  }
  0x36   : > { %2271 = vset.pattern.permute.xlu2 %v2392_v8  ;;  %2270 = vset.pattern.permute.xlu0 %v2392_v8 }
  0x37   : > { %541 = vperm.xlu2 %2271, %v2513_v3   ;;  %516 = vperm.xlu0 %2270, %v2503_v2  }
  0x3f   : > { %2273 = vset.pattern.permute.xlu2 %v2393_v9  ;;  %2272 = vset.pattern.permute.xlu0 %v2393_v9 }
  0x40   : > { %590 = vperm.xlu2 %2273, %v2513_v3   ;;  %565 = vperm.xlu0 %2272, %v2503_v2  }
  0x48   : > { %2274 = vset.pattern.permute.xlu0 %v2396_v23  ;;  %2275 = vset.pattern.permute.xlu2 %v2396_v23 }
  0x6e   : > { %v370_v13 = vpop.permute.xlu2 %369 }
  0x6f   : > { %v374_v14 = vmul.f32 %v370_v13, %v2567_v12  ;;  %v373_v15 = vmul.f32 %v370_v13, %v2564_v11  ;;  %v372_v16 = vmul.f32 %v370_v13, %v2561_v10 }
  0x71   : > { %382 = vrot.lane.b32.xlu1 %v374_v14, %s2394_s18  ;;  %380 = vrot.lane.b32.xlu0 %v373_v15, %s2394_s18 }
  0x72   : > { %378 = vrot.lane.b32.xlu2 %v372_v16, %s2394_s18 }
  0x76   : > { %v395_v17 = vpop.permute.xlu2 %394 }
  0x77   : > { %v398_v18 = vmul.f32 %v395_v17, %v2564_v11  ;;  %v397_v19 = vmul.f32 %v395_v17, %v2561_v10  ;;  %v399_v20 = vmul.f32 %v395_v17, %v2567_v12 }
  0x79   : > { %405 = vrot.lane.b32.xlu1 %v398_v18, %s2394_s18  ;;  %403 = vrot.lane.b32.xlu0 %v397_v19, %s2394_s18  ;;  %v2401_v19 = vmov 7  }
  0x7a   : > { %407 = vrot.lane.b32.xlu2 %v399_v20, %s2394_s18 }
  0x7f   : > { %v444_v21 = vpop.permute.xlu2 %443 }
  0x80   : > { %v446_v22 = vmul.f32 %v444_v21, %v2561_v10  ;;  %v448_v36 = vmul.f32 %v444_v21, %v2567_v12  ;;  %v447_v39 = vmul.f32 %v444_v21, %v2564_v11 }
  0x82   : > { %452 = vrot.lane.b32.xlu0 %v446_v22, %s2395_s19 }
  0x86   : > { %v2583_v24 = vpop.permute.xlu0 %338 }
  0x88   : > { %v493_v25 = vpop.permute.xlu2 %492 }
  0x89   : > { %v495_v26 = vmul.f32 %v493_v25, %v2561_v10  ;;  %v497_v41 = vmul.f32 %v493_v25, %v2567_v12  ;;  %v496_v45 = vmul.f32 %v493_v25, %v2564_v11 }
  0x8b   : > { %501 = vrot.lane.b32.xlu0 %v495_v26, %s2397_s27 }
  0x8e   : > { %v2587_v27 = vpop.permute.xlu0 %346 }
  0x91   : > { %v542_v28 = vpop.permute.xlu2 %541 }
  0x92   : > { %v544_v29 = vmul.f32 %v542_v28, %v2561_v10  ;;  %v546_v46 = vmul.f32 %v542_v28, %v2567_v12  ;;  %v545_v52 = vmul.f32 %v542_v28, %v2564_v11 }
  0x94   : > { %550 = vrot.lane.b32.xlu0 %v544_v29, %s2398_s29 }
  0x97   : > { %v419_v30 = vpop.permute.xlu0 %418 }
  0x98   : > { %v421_v31 = vmul.f32 %v419_v30, %v2561_v10  ;;  %v422_v32 = vmul.f32 %v419_v30, %v2564_v11  ;;  %v423_v35 = vmul.f32 %v419_v30, %v2567_v12 }
  0x9a   : > { %v591_v33 = vpop.permute.xlu2 %590  ;;  %427 = vrot.lane.b32.xlu1 %v421_v31, %s2395_s19  ;;  %429 = vrot.lane.b32.xlu2 %v422_v32, %s2395_s19 }
  0x9b   : > { %v593_v34 = vmul.f32 %v591_v33, %v2561_v10  ;;  %v595_v51 = vmul.f32 %v591_v33, %v2567_v12  ;;  %v594_v57 = vmul.f32 %v591_v33, %v2564_v11 }
  0x9d   : > { %599 = vrot.lane.b32.xlu0 %v593_v34, %s2399_s30  ;;  %v2403_v34 = vmov 8  }
  0xa0   : > { %v468_v37 = vpop.permute.xlu0 %467 }
  0xa1   : > { %v471_v38 = vmul.f32 %v468_v37, %v2564_v11  ;;  %v470_v40 = vmul.f32 %v468_v37, %v2561_v10  ;;  %v472_v43 = vmul.f32 %v468_v37, %v2567_v12 }
  0xa2   : > { %431 = vrot.lane.b32.xlu1 %v423_v35, %s2395_s19  ;;  %456 = vrot.lane.b32.xlu2 %v448_v36, %s2395_s19 }
  0xa5   : > { %614 = vperm.xlu0 %2274, %v2503_v2  }
  0xa9   : > { %v517_v42 = vpop.permute.xlu0 %516 }
  0xaa   : > { %454 = vrot.lane.b32.xlu1 %v447_v39, %s2395_s19  ;;  %478 = vrot.lane.b32.xlu2 %v471_v38, %s2397_s27  ;;  %v520_v44 = vmul.f32 %v517_v42, %v2564_v11  ;;  %v519_v48 = vmul.f32 %v517_v42, %v2561_v10  ;;  %v521_v50 = vmul.f32 %v517_v42, %v2567_v12 }
  0xad   : > { %2276 = vset.pattern.permute.xlu0 %v2401_v19 }
  0xb2   : > { %476 = vrot.lane.b32.xlu1 %v470_v40, %s2397_s27  ;;  %505 = vrot.lane.b32.xlu2 %v497_v41, %s2397_s27  ;;  %v566_v47 = vpop.permute.xlu0 %565 }
  0xb3   : > { %v569_v49 = vmul.f32 %v566_v47, %v2564_v11  ;;  %v568_v53 = vmul.f32 %v566_v47, %v2561_v10  ;;  %v570_v55 = vmul.f32 %v566_v47, %v2567_v12 }
  0xba   : > { %480 = vrot.lane.b32.xlu1 %v472_v43, %s2397_s27  ;;  %527 = vrot.lane.b32.xlu2 %v520_v44, %s2398_s29 }
  0xc2   : > { %503 = vrot.lane.b32.xlu1 %v496_v45, %s2397_s27  ;;  %554 = vrot.lane.b32.xlu2 %v546_v46, %s2398_s29  ;;  %v2405_v46 = vmov 9  }
  0xca   : > { %525 = vrot.lane.b32.xlu1 %v519_v48, %s2398_s29  ;;  %576 = vrot.lane.b32.xlu2 %v569_v49, %s2399_s30 }
  0xcc   : > { %v2646_v62 = vpop.permute.xlu2 %378 }
  0xd2   : > { %529 = vrot.lane.b32.xlu1 %v521_v50, %s2398_s29  ;;  %603 = vrot.lane.b32.xlu2 %v595_v51, %s2399_s30 }
  0xd4   : > { %v2652_v8 = vpop.permute.xlu2 %407 }
  0xda   : > { %552 = vrot.lane.b32.xlu1 %v545_v52, %s2398_s29 }
  0xe2   : > { %574 = vrot.lane.b32.xlu1 %v568_v53, %s2399_s30  ;;  %v2406_v53 = vmov 10  }
  0xe3   : > { %v2630_v54 = vpop.permute.xlu0 %380 }
  0xea   : > { %578 = vrot.lane.b32.xlu1 %v570_v55, %s2399_s30 }
  0xeb   : > { %v2634_v56 = vpop.permute.xlu0 %403 }
  0xf2   : > { %601 = vrot.lane.b32.xlu1 %v594_v57, %s2399_s30 }
  0xf4   : > { %v2638_v58 = vpop.permute.xlu0 %452  ;;  %v2657_v13 = vpop.permute.xlu2 %429 }
  0xfc   : > { %v2659_v14 = vpop.permute.xlu2 %456 }
  0xfd   : > { %v2640_v59 = vpop.permute.xlu0 %501 }
 0x104   : > { %v2661_v15 = vpop.permute.xlu2 %478 }
 0x106   : > { %v2642_v60 = vpop.permute.xlu0 %550 }
 0x10c   : > { %v2663_v16 = vpop.permute.xlu2 %505 }
 0x10f   : > { %v2644_v61 = vpop.permute.xlu0 %599 }
 0x110   : > { %3957 = vst [vmem:[#allocation2_spill] sm:$0xff] %v2644_v61 }
 0x114   : > { %v2665_v17 = vpop.permute.xlu2 %527 }
 0x117   : > { %v615_v63 = vpop.permute.xlu0 %614 }
 0x118   : > { %v617_v0 = vmul.f32 %v615_v63, %v2561_v10  ;;  %v618_v1 = vmul.f32 %v615_v63, %v2564_v11  ;;  %v619_v9 = vmul.f32 %v615_v63, %v2567_v12 }
 0x11a   : > { %623 = vrot.lane.b32.xlu1 %v617_v0, %s2400_s7  ;;  %625 = vrot.lane.b32.xlu2 %v618_v1, %s2400_s7 }
 0x11c   : > { %v2667_v18 = vpop.permute.xlu2 %554 }
 0x122   : > { %627 = vrot.lane.b32.xlu1 %v619_v9, %s2400_s7  ;;  %639 = vperm.xlu2 %2275, %v2513_v3  }
 0x124   : > { %v2669_v20 = vpop.permute.xlu2 %576 }
 0x12a   : > { %2277 = vset.pattern.permute.xlu2 %v2401_v19  ;;  %v2407_v19 = vmov 11  }
 0x12c   : > { %v2671_v21 = vpop.permute.xlu2 %603 }
 0x12d   : > { %3958 = vst [vmem:[#allocation3_spill] sm:$0xff] %v2671_v21 }
 0x174   : > { %v2673_v22 = vpop.permute.xlu2 %625 }
 0x17c   : > { %v640_v23 = vpop.permute.xlu2 %639 }
 0x17d   : > { %v644_v25 = vmul.f32 %v640_v23, %v2567_v12  ;;  %v643_v26 = vmul.f32 %v640_v23, %v2564_v11  ;;  %v642_v28 = vmul.f32 %v640_v23, %v2561_v10 }
 0x17f   : > { %652 = vrot.lane.b32.xlu2 %v644_v25, %s2400_s7  ;;  %650 = vrot.lane.b32.xlu1 %v643_v26, %s2400_s7 }
 0x180   : > { %648 = vrot.lane.b32.xlu0 %v642_v28, %s2400_s7 }
 0x188   : > { %663 = vperm.xlu0 %2276, %v2503_v2  }
 0x190   : > { %2278 = vset.pattern.permute.xlu0 %v2403_v34 }
 0x1d9   : > { %v2691_v35 = vpop.permute.xlu2 %652 }
 0x1da   : > { %3960 = vst [vmem:[#allocation5_spill] sm:$0xff] %v2691_v35 }
 0x1f2   : > { %v2682_v29 = vpop.permute.xlu0 %648 }
 0x1f3   : > { %3959 = vst [vmem:[#allocation4_spill] sm:$0xff] %v2682_v29 }
 0x1fa   : > { %v664_v30 = vpop.permute.xlu0 %663 }
 0x1fb   : > { %v667_v31 = vmul.f32 %v664_v30, %v2564_v11  ;;  %v666_v32 = vmul.f32 %v664_v30, %v2561_v10  ;;  %v668_v33 = vmul.f32 %v664_v30, %v2567_v12 }
 0x1fd   : > { %674 = vrot.lane.b32.xlu2 %v667_v31, %s2402_s8  ;;  %672 = vrot.lane.b32.xlu1 %v666_v32, %s2402_s8 }
 0x205   : > { %688 = vperm.xlu2 %2277, %v2513_v3   ;;  %676 = vrot.lane.b32.xlu1 %v668_v33, %s2402_s8 }
 0x20d   : > { %2279 = vset.pattern.permute.xlu2 %v2403_v34 }
 0x257   : > { %v2693_v36 = vpop.permute.xlu2 %674 }
 0x25f   : > { %v689_v37 = vpop.permute.xlu2 %688 }
 0x260   : > { %v693_v38 = vmul.f32 %v689_v37, %v2567_v12  ;;  %v691_v39 = vmul.f32 %v689_v37, %v2561_v10  ;;  %v692_v40 = vmul.f32 %v689_v37, %v2564_v11 }
 0x262   : > { %701 = vrot.lane.b32.xlu2 %v693_v38, %s2402_s8  ;;  %697 = vrot.lane.b32.xlu0 %v691_v39, %s2402_s8 }
 0x263   : > { %699 = vrot.lane.b32.xlu1 %v692_v40, %s2402_s8 }
 0x26a   : > { %712 = vperm.xlu0 %2278, %v2503_v2  }
 0x272   : > { %2280 = vset.pattern.permute.xlu0 %v2405_v46 }
 0x2bc   : > { %v2711_v47 = vpop.permute.xlu2 %701 }
 0x2bd   : > { %3962 = vst [vmem:[#allocation7_spill] sm:$0xff] %v2711_v47 }
 0x2d4   : > { %v2702_v41 = vpop.permute.xlu0 %697 }
 0x2d5   : > { %3961 = vst [vmem:[#allocation6_spill] sm:$0xff] %v2702_v41 }
 0x2dc   : > { %v713_v42 = vpop.permute.xlu0 %712 }
 0x2dd   : > { %v716_v43 = vmul.f32 %v713_v42, %v2564_v11  ;;  %v715_v44 = vmul.f32 %v713_v42, %v2561_v10  ;;  %v717_v45 = vmul.f32 %v713_v42, %v2567_v12  ;;  %v2761_v42 = vpop.permute.xlu1 %354 }
 0x2df   : > { %723 = vrot.lane.b32.xlu2 %v716_v43, %s2404_s10  ;;  %721 = vrot.lane.b32.xlu1 %v715_v44, %s2404_s10 }
 0x2e5   : > { %v2763_v43 = vpop.permute.xlu1 %362 }
 0x2e7   : > { %737 = vperm.xlu2 %2279, %v2513_v3   ;;  %725 = vrot.lane.b32.xlu1 %v717_v45, %s2404_s10 }
 0x2ed   : > { %v2765_v44 = vpop.permute.xlu1 %382 }
 0x2ef   : > { %2282 = vset.pattern.permute.xlu2 %v2405_v46 }
 0x2f5   : > { %v2767_v45 = vpop.permute.xlu1 %405 }
 0x2fd   : > { %v2769_v46 = vpop.permute.xlu1 %427 }
 0x339   : > { %v2713_v48 = vpop.permute.xlu2 %723 }
 0x341   : > { %v738_v49 = vpop.permute.xlu2 %737 }
 0x342   : > { %v742_v50 = vmul.f32 %v738_v49, %v2567_v12  ;;  %v740_v51 = vmul.f32 %v738_v49, %v2561_v10  ;;  %v741_v52 = vmul.f32 %v738_v49, %v2564_v11  ;;  %v2771_v49 = vpop.permute.xlu1 %431 }
 0x344   : > { %750 = vrot.lane.b32.xlu2 %v742_v50, %s2404_s10  ;;  %746 = vrot.lane.b32.xlu0 %v740_v51, %s2404_s10  ;;  %v2408_v51 = vmov 12  }
 0x345   : > { %748 = vrot.lane.b32.xlu1 %v741_v52, %s2404_s10 }
 0x34a   : > { %v2773_v50 = vpop.permute.xlu1 %454 }
 0x34c   : > { %775 = vperm.xlu2 %2282, %v2513_v3   ;;  %761 = vperm.xlu0 %2280, %v2503_v2  }
 0x34d   : > { %768 = vperm.xlu1 %2281, %v2522_v4  }
 0x352   : > { %v2775_v52 = vpop.permute.xlu1 %476 }
 0x354   : > { %2283 = vset.pattern.permute.xlu2 %v2406_v53  ;;  %2284 = vset.pattern.permute.xlu0 %v2406_v53 }
 0x355   : > { %782 = vperm.xlu1 %2281, %v2532_v5   ;;  %789 = vperm.xlu2 %2283, %v2503_v2  }
 0x35a   : > { %v2777_v53 = vpop.permute.xlu1 %480 }
 0x35d   : > { %2285 = vset.pattern.permute.xlu2 %v2407_v19 }
 0x39e   : > { %v2726_v55 = vpop.permute.xlu2 %750 }
 0x39f   : > { %3963 = vst [vmem:[#allocation8_spill] sm:$0xff] %v2726_v55 }
 0x3a6   : > { %v2728_v57 = vpop.permute.xlu2 %775 }
 0x3a7   : > { %3964 = vst [vmem:[#allocation9_spill] sm:$0xff] %v2728_v57 }
 0x3af   : > { %v790_v63 = vpop.permute.xlu2 %789 }
 0x3b0   : > { %v794_v0 = vmul.f32 %v790_v63, %v2567_v12  ;;  %v792_v1 = vmul.f32 %v790_v63, %v2561_v10  ;;  %v793_v9 = vmul.f32 %v790_v63, %v2564_v11 }
 0x3b2   : > { %802 = vrot.lane.b32.xlu2 %v794_v0, %s2394_s18  ;;  %798 = vrot.lane.b32.xlu0 %v792_v1, %s2394_s18  ;;  %v2779_v1 = vpop.permute.xlu1 %503 }
 0x3b3   : > { %800 = vrot.lane.b32.xlu1 %v793_v9, %s2394_s18 }
 0x3b6   : > { %v2737_v23 = vpop.permute.xlu0 %746 }
 0x3b7   : > { %3965 = vst [vmem:[#allocation10_spill] sm:$0xff] %v2737_v23 }
 0x3ba   : > { %813 = vperm.xlu0 %2284, %v2513_v3  }
 0x3be   : > { %v2739_v25 = vpop.permute.xlu0 %761 }
 0x3bf   : > { %3966 = vst [vmem:[#allocation11_spill] sm:$0xff] %v2739_v25 }
 0x3c2   : > { %2286 = vset.pattern.permute.xlu0 %v2407_v19 }
 0x40c   : > { %v2750_v33 = vpop.permute.xlu2 %802 }
 0x40d   : > { %3967 = vst [vmem:[#allocation12_spill] sm:$0xff] %v2750_v33 }
 0x424   : > { %v2741_v26 = vpop.permute.xlu0 %798 }
 0x42c   : > { %v814_v28 = vpop.permute.xlu0 %813 }
 0x42d   : > { %v817_v30 = vmul.f32 %v814_v28, %v2564_v11  ;;  %v816_v31 = vmul.f32 %v814_v28, %v2561_v10  ;;  %v818_v32 = vmul.f32 %v814_v28, %v2567_v12 }
 0x42f   : > { %824 = vrot.lane.b32.xlu2 %v817_v30, %s2394_s18  ;;  %822 = vrot.lane.b32.xlu1 %v816_v31, %s2394_s18  ;;  %v2786_v30 = vpop.permute.xlu1 %525 }
 0x437   : > { %837 = vperm.xlu2 %2285, %v2503_v2   ;;  %826 = vrot.lane.b32.xlu1 %v818_v32, %s2394_s18  ;;  %v2790_v31 = vpop.permute.xlu1 %529 }
 0x43f   : > { %2287 = vset.pattern.permute.xlu2 %v2408_v51  ;;  %v2792_v32 = vpop.permute.xlu1 %552 }
 0x489   : > { %v2752_v34 = vpop.permute.xlu2 %824 }
 0x48a   : > { %3968 = vst [vmem:[#allocation13_spill] sm:$0xff] %v2752_v34 }
 0x491   : > { %v838_v37 = vpop.permute.xlu2 %837 }
 0x492   : > { %v842_v38 = vmul.f32 %v838_v37, %v2567_v12  ;;  %v840_v39 = vmul.f32 %v838_v37, %v2561_v10  ;;  %v841_v40 = vmul.f32 %v838_v37, %v2564_v11  ;;  %v2794_v37 = vpop.permute.xlu1 %574 }
 0x494   : > { %850 = vrot.lane.b32.xlu2 %v842_v38, %s2395_s19  ;;  %846 = vrot.lane.b32.xlu0 %v840_v39, %s2395_s19 }
 0x495   : > { %848 = vrot.lane.b32.xlu1 %v841_v40, %s2395_s19 }
 0x49a   : > { %v2796_v38 = vpop.permute.xlu1 %578 }
 0x49b   : > { %3969 = vst [vmem:[#allocation14_spill] sm:$0xff] %v2796_v38 }
 0x49c   : > { %861 = vperm.xlu0 %2286, %v2513_v3  }
 0x4a2   : > { %v2798_v39 = vpop.permute.xlu1 %601 }
 0x4a3   : > { %3970 = vst [vmem:[#allocation15_spill] sm:$0xff] %v2798_v39 }
 0x4a4   : > { %2288 = vset.pattern.permute.xlu0 %v2408_v51 }
 0x4aa   : > { %v2800_v40 = vpop.permute.xlu1 %623 }
 0x4b2   : > { %v2802_v51 = vpop.permute.xlu1 %627 }
 0x4b3   : > { %3971 = vst [vmem:[#allocation16_spill] sm:$0xff] %v2802_v51 }
 0x506   : > { %v847_v63 = vpop.permute.xlu0 %846 }
 0x50e   : > { %v862_v0 = vpop.permute.xlu0 %861 }
 0x50f   : > { %v864_v9 = vmul.f32 %v862_v0, %v2561_v10  ;;  %v865_v19 = vmul.f32 %v862_v0, %v2564_v11  ;;  %v866_v28 = vmul.f32 %v862_v0, %v2567_v12  ;;  %v2804_v0 = vpop.permute.xlu2 %850 }
 0x510   : > { %3972 = vst [vmem:[#allocation17_spill] sm:$0xff] %v2804_v0 }
 0x511   : > { %872 = vrot.lane.b32.xlu2 %v865_v19, %s2395_s19  ;;  %870 = vrot.lane.b32.xlu1 %v864_v9, %s2395_s19  ;;  %v2806_v9 = vpop.permute.xlu1 %650 }
 0x512   : > { %3973 = vst [vmem:[#allocation18_spill] sm:$0xff] %v2806_v9 }
 0x519   : > { %885 = vperm.xlu2 %2287, %v2503_v2   ;;  %874 = vrot.lane.b32.xlu1 %v866_v28, %s2395_s19  ;;  %v2810_v28 = vpop.permute.xlu1 %672 }
 0x521   : > { %v2817_v55 = vpop.permute.xlu1 %676 }
 0x522   : > { %3975 = vst [vmem:[#allocation20_spill] sm:$0xff] %v2817_v55  ;;  %v2409_v55 = vmov 13  }
 0x523   : > { %2289 = vset.pattern.permute.xlu2 %v2409_v55 }
 0x56b   : > { %v2808_v19 = vpop.permute.xlu2 %872 }
 0x56c   : > { %3974 = vst [vmem:[#allocation19_spill] sm:$0xff] %v2808_v19  ;;  %v2821_v19 = vpop.permute.xlu1 %699 }
 0x56d   : > { %3976 = vst [vmem:[#allocation21_spill] sm:$0xff] %v2821_v19 }
 0x573   : > { %v886_v7 = vpop.permute.xlu2 %885 }
 0x574   : > { %v890_v6 = vmul.f32 %v886_v7, %v2567_v12  ;;  %v888_v23 = vmul.f32 %v886_v7, %v2561_v10  ;;  %v889_v34 = vmul.f32 %v886_v7, %v2564_v11  ;;  %v2823_v0 = vpop.permute.xlu1 %721 }
 0x576   : > { %898 = vrot.lane.b32.xlu2 %v890_v6, %s2397_s27  ;;  %894 = vrot.lane.b32.xlu0 %v888_v23, %s2397_s27 }
 0x577   : > { %896 = vrot.lane.b32.xlu1 %v889_v34, %s2397_s27 }
 0x57c   : > { %v2825_v41 = vpop.permute.xlu1 %725 }
 0x57d   : > { %3977 = vst [vmem:[#allocation22_spill] sm:$0xff] %v2825_v41 }
 0x57e   : > { %909 = vperm.xlu0 %2288, %v2513_v3  }
 0x584   : > { %v2827_v33 = vpop.permute.xlu1 %748 }
 0x585   : > { %3978 = vst [vmem:[#allocation23_spill] sm:$0xff] %v2827_v33  ;;  %v764_v33 = vmul.f32 %v2739_v25, %v2561_v10 }
 0x586   : > { %2290 = vset.pattern.permute.xlu0 %v2409_v55 }
 0x58c   : > { %v2829_v47 = vpop.permute.xlu1 %768 }
 0x58d   : > { %3979 = vst [vmem:[#allocation24_spill] sm:$0xff] %v2829_v47 }
 0x594   : > { %v2831_v7 = vpop.permute.xlu1 %782 }
 0x595   : > { %3980 = vst [vmem:[#allocation25_spill] sm:$0xff] %v2831_v7 }
 0x59c   : > { %v2833_v6 = vpop.permute.xlu1 %800 }
 0x59d   : > { %3981 = vst [vmem:[#allocation26_spill] sm:$0xff] %v2833_v6  ;;  %v804_v7 = vsel %vm384_vm0, %v2741_v26, %v2833_v6 }
 0x5a4   : > { %v2835_v23 = vpop.permute.xlu1 %822 }
 0x5a5   : > { %3982 = vst [vmem:[#allocation27_spill] sm:$0xff] %v2835_v23  ;;  %v771_v23 = vadd.f32 %v2829_v47, %v764_v33 }
 0x5a7   : > { %v809_v29 = vadd.f32 %v804_v7, %v771_v23 }
 0x5ac   : > { %v2837_v57 = vpop.permute.xlu1 %826 }
 0x5ad   : > { %3983 = vst [vmem:[#allocation28_spill] sm:$0xff] %v2837_v57 }
 0x5b4   : > { %v2839_v34 = vpop.permute.xlu1 %848 }
 0x5b5   : > { %3984 = vst [vmem:[#allocation29_spill] sm:$0xff] %v2839_v34  ;;  %v852_v57 = vsel %vm433_vm1, %v847_v63, %v2839_v34 }
 0x5bc   : > { %v2841_v19 = vpop.permute.xlu1 %870 }
 0x5bd   : > { %3985 = vst [vmem:[#allocation30_spill] sm:$0xff] %v2841_v19  ;;  %v857_v19 = vadd.f32 %v852_v57, %v809_v29 }
 0x5c4   : > { %v2845_v41 = vpop.permute.xlu1 %874 }
 0x5c5   : > { %3986 = vst [vmem:[#allocation31_spill] sm:$0xff] %v2845_v41 }
 0x5d0   : > { %v2864_v29 = vpop.permute.xlu2 %898 }
 0x5d1   : > { %3988 = vst [vmem:[#allocation33_spill] sm:$0xff] %v2864_v29 }
 0x5e8   : > { %v895_v55 = vpop.permute.xlu0 %894 }
 0x5e9   : > { %v2853_v9 = vpop.permute.xlu1 %896 }
 0x5ea   : > { %3987 = vst [vmem:[#allocation32_spill] sm:$0xff] %v2853_v9  ;;  %v900_v41 = vsel %vm482_vm2, %v895_v55, %v2853_v9 }
 0x5eb   : > { %v905_v35 = vadd.f32 %v900_v41, %v857_v19 }
 0x5f0   : > { %v910_v51 = vpop.permute.xlu0 %909 }
 0x5f1   : > { %v912_v61 = vmul.f32 %v910_v51, %v2561_v10  ;;  %v913_v26 = vmul.f32 %v910_v51, %v2564_v11  ;;  %v914_v33 = vmul.f32 %v910_v51, %v2567_v12 }
 0x5f3   : > { %920 = vrot.lane.b32.xlu2 %v913_v26, %s2397_s27  ;;  %918 = vrot.lane.b32.xlu1 %v912_v61, %s2397_s27  ;;  %v2410_v61 = vmov 14  }
 0x5fb   : > { %933 = vperm.xlu2 %2289, %v2503_v2   ;;  %922 = vrot.lane.b32.xlu1 %v914_v33, %s2397_s27 }
 0x603   : > { %2291 = vset.pattern.permute.xlu2 %v2410_v61 }
 0x64d   : > { %v2866_v57 = vpop.permute.xlu2 %920 }
 0x64e   : > { %3989 = vst [vmem:[#allocation34_spill] sm:$0xff] %v2866_v57 }
 0x655   : > { %v934_v41 = vpop.permute.xlu2 %933 }
 0x656   : > { %v938_v63 = vmul.f32 %v934_v41, %v2567_v12  ;;  %v936_v19 = vmul.f32 %v934_v41, %v2561_v10  ;;  %v937_v7 = vmul.f32 %v934_v41, %v2564_v11 }
 0x658   : > { %946 = vrot.lane.b32.xlu2 %v938_v63, %s2398_s29  ;;  %942 = vrot.lane.b32.xlu0 %v936_v19, %s2398_s29 }
 0x659   : > { %944 = vrot.lane.b32.xlu1 %v937_v7, %s2398_s29 }
 0x660   : > { %957 = vperm.xlu0 %2290, %v2513_v3  }
 0x665   : > { %v2875_v51 = vpop.permute.xlu1 %918 }
 0x666   : > { %3990 = vst [vmem:[#allocation35_spill] sm:$0xff] %v2875_v51 }
 0x668   : > { %2292 = vset.pattern.permute.xlu0 %v2410_v61 }
 0x66d   : > { %v2877_v23 = vpop.permute.xlu1 %922 }
 0x66e   : > { %3991 = vst [vmem:[#allocation36_spill] sm:$0xff] %v2877_v23 }
 0x6b2   : > { %v2890_v51 = vpop.permute.xlu2 %946 }
 0x6b3   : > { %3993 = vst [vmem:[#allocation38_spill] sm:$0xff] %v2890_v51 }
 0x6ca   : > { %v943_v55 = vpop.permute.xlu0 %942 }
 0x6cb   : > { %v2879_v26 = vpop.permute.xlu1 %944 }
 0x6cc   : > { %3992 = vst [vmem:[#allocation37_spill] sm:$0xff] %v2879_v26  ;;  %v948_v33 = vsel %vm531_vm3, %v943_v55, %v2879_v26 }
 0x6cd   : > { %v953_v41 = vadd.f32 %v948_v33, %v905_v35 }
 0x6d2   : > { %v958_v63 = vpop.permute.xlu0 %957 }
 0x6d3   : > { %v960_v19 = vmul.f32 %v958_v63, %v2561_v10  ;;  %v961_v7 = vmul.f32 %v958_v63, %v2564_v11  ;;  %v962_v61 = vmul.f32 %v958_v63, %v2567_v12  ;;  %v2411_v63 = vmov 15  }
 0x6d5   : > { %968 = vrot.lane.b32.xlu2 %v961_v7, %s2398_s29  ;;  %966 = vrot.lane.b32.xlu1 %v960_v19, %s2398_s29 }
 0x6dd   : > { %981 = vperm.xlu2 %2291, %v2503_v2   ;;  %970 = vrot.lane.b32.xlu1 %v962_v61, %s2398_s29 }
 0x6e5   : > { %2293 = vset.pattern.permute.xlu2 %v2411_v63 }
 0x72f   : > { %v2892_v57 = vpop.permute.xlu2 %968 }
 0x730   : > { %3994 = vst [vmem:[#allocation39_spill] sm:$0xff] %v2892_v57 }
 0x737   : > { %v982_v35 = vpop.permute.xlu2 %981 }
 0x738   : > { %v986_v55 = vmul.f32 %v982_v35, %v2567_v12  ;;  %v984_v33 = vmul.f32 %v982_v35, %v2561_v10  ;;  %v985_v26 = vmul.f32 %v982_v35, %v2564_v11 }
 0x73a   : > { %994 = vrot.lane.b32.xlu2 %v986_v55, %s2399_s30  ;;  %990 = vrot.lane.b32.xlu0 %v984_v33, %s2399_s30 }
 0x73b   : > { %992 = vrot.lane.b32.xlu1 %v985_v26, %s2399_s30 }
 0x742   : > { %1005 = vperm.xlu0 %2292, %v2513_v3  }
 0x747   : > { %v2901_v19 = vpop.permute.xlu1 %966 }
 0x748   : > { %3995 = vst [vmem:[#allocation40_spill] sm:$0xff] %v2901_v19 }
 0x74a   : > { %2294 = vset.pattern.permute.xlu0 %v2411_v63 }
 0x74f   : > { %v2903_v7 = vpop.permute.xlu1 %970 }
 0x750   : > { %3996 = vst [vmem:[#allocation41_spill] sm:$0xff] %v2903_v7 }
 0x794   : > { %v2916_v19 = vpop.permute.xlu2 %994 }
 0x795   : > { %3998 = vst [vmem:[#allocation43_spill] sm:$0xff] %v2916_v19 }
 0x7ac   : > { %v991_v61 = vpop.permute.xlu0 %990 }
 0x7ad   : > { %v2905_v57 = vpop.permute.xlu1 %992 }
 0x7ae   : > { %3997 = vst [vmem:[#allocation42_spill] sm:$0xff] %v2905_v57  ;;  %v996_v35 = vsel %vm580_vm4, %v991_v61, %v2905_v57 }
 0x7af   : > { %v1001_v55 = vadd.f32 %v996_v35, %v953_v41 }
 0x7b4   : > { %v1006_v33 = vpop.permute.xlu0 %1005 }
 0x7b5   : > { %v1008_v26 = vmul.f32 %v1006_v33, %v2561_v10  ;;  %v1009_v9 = vmul.f32 %v1006_v33, %v2564_v11  ;;  %v1010_v63 = vmul.f32 %v1006_v33, %v2567_v12 }
 0x7b7   : > { %1016 = vrot.lane.b32.xlu2 %v1009_v9, %s2399_s30  ;;  %1014 = vrot.lane.b32.xlu1 %v1008_v26, %s2399_s30  ;;  %v2412_v9 = vmov 16  }
 0x7bf   : > { %1029 = vperm.xlu2 %2293, %v2503_v2   ;;  %1018 = vrot.lane.b32.xlu1 %v1010_v63, %s2399_s30 }
 0x7c7   : > { %2295 = vset.pattern.permute.xlu2 %v2412_v9 }
 0x811   : > { %v2918_v34 = vpop.permute.xlu2 %1016 }
 0x812   : > { %3999 = vst [vmem:[#allocation44_spill] sm:$0xff] %v2918_v34 }
 0x819   : > { %v1030_v41 = vpop.permute.xlu2 %1029 }
 0x81a   : > { %v1034_v61 = vmul.f32 %v1030_v41, %v2567_v12  ;;  %v1032_v35 = vmul.f32 %v1030_v41, %v2561_v10  ;;  %v1033_v57 = vmul.f32 %v1030_v41, %v2564_v11 }
 0x81c   : > { %1042 = vrot.lane.b32.xlu2 %v1034_v61, %s2400_s7  ;;  %1038 = vrot.lane.b32.xlu0 %v1032_v35, %s2400_s7 }
 0x81d   : > { %1040 = vrot.lane.b32.xlu1 %v1033_v57, %s2400_s7 }
 0x824   : > { %1053 = vperm.xlu0 %2294, %v2513_v3  }
 0x829   : > { %v2927_v33 = vpop.permute.xlu1 %1014 }
 0x82a   : > { %4000 = vst [vmem:[#allocation45_spill] sm:$0xff] %v2927_v33 }
 0x82c   : > { %2296 = vset.pattern.permute.xlu0 %v2412_v9 }
 0x831   : > { %v2929_v26 = vpop.permute.xlu1 %1018 }
 0x832   : > { %4001 = vst [vmem:[#allocation46_spill] sm:$0xff] %v2929_v26 }
 0x876   : > { %v2942_v33 = vpop.permute.xlu2 %1042 }
 0x877   : > { %4003 = vst [vmem:[#allocation48_spill] sm:$0xff] %v2942_v33 }
 0x88e   : > { %v1039_v63 = vpop.permute.xlu0 %1038 }
 0x88f   : > { %v2931_v34 = vpop.permute.xlu1 %1040 }
 0x890   : > { %4002 = vst [vmem:[#allocation47_spill] sm:$0xff] %v2931_v34  ;;  %v1044_v41 = vsel %vm629_vm5, %v1039_v63, %v2931_v34 }
 0x891   : > { %v1049_v61 = vadd.f32 %v1044_v41, %v1001_v55 }
 0x896   : > { %v1054_v35 = vpop.permute.xlu0 %1053 }
 0x897   : > { %v1056_v57 = vmul.f32 %v1054_v35, %v2561_v10  ;;  %v1057_v19 = vmul.f32 %v1054_v35, %v2564_v11  ;;  %v1058_v9 = vmul.f32 %v1054_v35, %v2567_v12 }
 0x899   : > { %1064 = vrot.lane.b32.xlu2 %v1057_v19, %s2400_s7  ;;  %1062 = vrot.lane.b32.xlu1 %v1056_v57, %s2400_s7  ;;  %v2413_v19 = vmov 17  }
 0x8a1   : > { %1077 = vperm.xlu2 %2295, %v2503_v2   ;;  %1066 = vrot.lane.b32.xlu1 %v1058_v9, %s2400_s7 }
 0x8a9   : > { %2297 = vset.pattern.permute.xlu2 %v2413_v19 }
 0x8f3   : > { %v2944_v26 = vpop.permute.xlu2 %1064 }
 0x8f4   : > { %4004 = vst [vmem:[#allocation49_spill] sm:$0xff] %v2944_v26 }
 0x8fb   : > { %v1078_v55 = vpop.permute.xlu2 %1077 }
 0x8fc   : > { %v1082_v63 = vmul.f32 %v1078_v55, %v2567_v12  ;;  %v1080_v41 = vmul.f32 %v1078_v55, %v2561_v10  ;;  %v1081_v34 = vmul.f32 %v1078_v55, %v2564_v11 }
 0x8fe   : > { %1090 = vrot.lane.b32.xlu2 %v1082_v63, %s2402_s8  ;;  %1086 = vrot.lane.b32.xlu0 %v1080_v41, %s2402_s8 }
 0x8ff   : > { %1088 = vrot.lane.b32.xlu1 %v1081_v34, %s2402_s8 }
 0x906   : > { %1101 = vperm.xlu0 %2296, %v2513_v3  }
 0x90b   : > { %v2953_v35 = vpop.permute.xlu1 %1062 }
 0x90c   : > { %4005 = vst [vmem:[#allocation50_spill] sm:$0xff] %v2953_v35 }
 0x90e   : > { %2298 = vset.pattern.permute.xlu0 %v2413_v19 }
 0x913   : > { %v2955_v57 = vpop.permute.xlu1 %1066 }
 0x914   : > { %4006 = vst [vmem:[#allocation51_spill] sm:$0xff] %v2955_v57 }
 0x958   : > { %v2968_v35 = vpop.permute.xlu2 %1090 }
 0x959   : > { %4008 = vst [vmem:[#allocation53_spill] sm:$0xff] %v2968_v35 }
 0x970   : > { %v1087_v9 = vpop.permute.xlu0 %1086 }
 0x971   : > { %v2957_v26 = vpop.permute.xlu1 %1088 }
 0x972   : > { %4007 = vst [vmem:[#allocation52_spill] sm:$0xff] %v2957_v26  ;;  %v1092_v55 = vsel %vm678_vm6, %v1087_v9, %v2957_v26 }
 0x973   : > { %v1097_v63 = vadd.f32 %v1092_v55, %v1049_v61 }
 0x978   : > { %v1102_v41 = vpop.permute.xlu0 %1101 }
 0x979   : > { %v1104_v34 = vmul.f32 %v1102_v41, %v2561_v10  ;;  %v1105_v33 = vmul.f32 %v1102_v41, %v2564_v11  ;;  %v1106_v19 = vmul.f32 %v1102_v41, %v2567_v12 }
 0x97b   : > { %1112 = vrot.lane.b32.xlu2 %v1105_v33, %s2402_s8  ;;  %1110 = vrot.lane.b32.xlu1 %v1104_v34, %s2402_s8  ;;  %v4010_v33 = vmov 2   ;;  %v2414_v34 = vmov 18  }
 0x97c   : > { %2301 = vset.pattern.permute.xlu1 %v2414_v34 }
 0x983   : > { %1125 = vperm.xlu2 %2297, %v2503_v2   ;;  %1114 = vrot.lane.b32.xlu1 %v1106_v19, %s2402_s8 }
 0x98b   : > { %2299 = vset.pattern.permute.xlu2 %v2414_v34 }
 0x9d5   : > { %v2970_v57 = vpop.permute.xlu2 %1112 }
 0x9d6   : > { %4009 = vst [vmem:[#allocation54_spill] sm:$0xff] %v2970_v57 }
 0x9dd   : > { %v1126_v61 = vpop.permute.xlu2 %1125 }
 0x9de   : > { %v1130_v9 = vmul.f32 %v1126_v61, %v2567_v12  ;;  %v1128_v55 = vmul.f32 %v1126_v61, %v2561_v10  ;;  %v1129_v26 = vmul.f32 %v1126_v61, %v2564_v11 }
 0x9e0   : > { %1138 = vrot.lane.b32.xlu2 %v1130_v9, %s2404_s10  ;;  %1134 = vrot.lane.b32.xlu0 %v1128_v55, %s2404_s10 }
 0x9e1   : > { %1136 = vrot.lane.b32.xlu1 %v1129_v26, %s2404_s10 }
 0x9e8   : > { %1149 = vperm.xlu0 %2298, %v2513_v3  }
 0x9ed   : > { %v2981_v41 = vpop.permute.xlu1 %1110 }
 0x9ee   : > { %4011 = vst [vmem:[#allocation55_spill] sm:$0xff] %v2981_v41 }
 0x9f0   : > { %2300 = vset.pattern.permute.xlu0 %v4010_v33 }
 0x9f1   : > { %1186 = vperm.xlu0 %2300, %v2522_v4  }
 0x9f5   : > { %v2983_v19 = vpop.permute.xlu1 %1114 }
 0x9f6   : > { %4012 = vst [vmem:[#allocation56_spill] sm:$0xff] %v2983_v19 }
 0xa52   : > { %v1135_v61 = vpop.permute.xlu0 %1134 }
 0xa53   : > { %v2985_v9 = vpop.permute.xlu1 %1136 }
 0xa54   : > { %4013 = vst [vmem:[#allocation57_spill] sm:$0xff] %v2985_v9  ;;  %v1140_v26 = vsel %vm727_vm7, %v1135_v61, %v2985_v9  ;;  %v4014_v61 = vmov 3  }
 0xa55   : > { %v2989_v55 = vadd.f32 %v1140_v26, %v1097_v63  ;;  %v2415_v63 = vmov 19  }
 0xa5a   : > { %v1150_v57 = vpop.permute.xlu0 %1149 }
 0xa5b   : > { %v1152_v35 = vmul.f32 %v1150_v57, %v2561_v10  ;;  %v1153_v4 = vmul.f32 %v1150_v57, %v2564_v11  ;;  %v1154_v34 = vmul.f32 %v1150_v57, %v2567_v12 }
 0xa5d   : > { %1160 = vrot.lane.b32.xlu2 %v1153_v4, %s2404_s10  ;;  %1158 = vrot.lane.b32.xlu1 %v1152_v35, %s2404_s10 }
 0xa65   : > { %1162 = vrot.lane.b32.xlu1 %v1154_v34, %s2404_s10  ;;  %1179 = vperm.xlu2 %2299, %v2503_v2  }
 0xa6d   : > { %1193 = vperm.xlu1 %2301, %v2513_v3   ;;  %2302 = vset.pattern.permute.xlu2 %v4010_v33 }
 0xa6e   : > { %1200 = vperm.xlu2 %2302, %v2532_v5  }
 0xa75   : > { %2303 = vset.pattern.permute.xlu1 %v2415_v63 }
 0xa76   : > { %1207 = vperm.xlu1 %2303, %v2503_v2   ;;  %2304 = vset.pattern.permute.xlu2 %v2415_v63  ;;  %v3016_v63 = vpop.permute.xlu2 %1138 }
 0xa77   : > { %4018 = vst [vmem:[#allocation61_spill] sm:$0xff] %v3016_v63 }
 0xa7e   : > { %2320 = vset.pattern.permute.xlu1 %v4014_v61 }
 0xab7   : > { %v3018_v61 = vpop.permute.xlu2 %1160 }
 0xab8   : > { %4019 = vst [vmem:[#allocation62_spill] sm:$0xff] %v3018_v61 }
 0xabf   : > { %v3020_v41 = vpop.permute.xlu2 %1179 }
 0xac8   : > { %v3022_v9 = vpop.permute.xlu2 %1200 }
 0xac9   : > { %4020 = vst [vmem:[#allocation63_spill] sm:$0xff] %v3022_v9 }
 0xacf   : > { %v3003_v35 = vpop.permute.xlu1 %1158 }
 0xad0   : > { %4015 = vst [vmem:[#allocation58_spill] sm:$0xff] %v3003_v35  ;;  %v2416_v35 = vmov 20  }
 0xad1   : > { %2305 = vset.pattern.permute.xlu0 %v2416_v35 }
 0xad7   : > { %v3005_v57 = vpop.permute.xlu1 %1162 }
 0xad8   : > { %4016 = vst [vmem:[#allocation59_spill] sm:$0xff] %v3005_v57 }
 0xadf   : > { %v3007_v26 = vpop.permute.xlu1 %1193 }
 0xae0   : > { %4017 = vst [vmem:[#allocation60_spill] sm:$0xff] %v3007_v26  ;;  %v1196_v47 = vmul.f32 %v3007_v26, %v2561_v10 }
 0xae2   : > { %v1203_v39 = vadd.f32 %v3022_v9, %v1196_v47 }
 0xae8   : > { %v1208_v4 = vpop.permute.xlu1 %1207 }
 0xae9   : > { %v1210_v34 = vmul.f32 %v1208_v4, %v2561_v10  ;;  %v1211_v33 = vmul.f32 %v1208_v4, %v2564_v11  ;;  %v1212_v5 = vmul.f32 %v1208_v4, %v2567_v12 }
 0xaeb   : > { %1220 = vrot.lane.b32.xlu1 %v1212_v5, %s2394_s18  ;;  %1218 = vrot.lane.b32.xlu0 %v1211_v33, %s2394_s18 }
 0xaec   : > { %1216 = vrot.lane.b32.xlu2 %v1210_v34, %s2394_s18 }
 0xaf4   : > { %1231 = vperm.xlu2 %2304, %v2513_v3  }
 0xafc   : > { %2306 = vset.pattern.permute.xlu2 %v2416_v35  ;;  %v3031_v35 = vpop.permute.xlu0 %1186 }
 0xb46   : > { %v1217_v4 = vpop.permute.xlu2 %1216 }
 0xb4e   : > { %v1232_v57 = vpop.permute.xlu2 %1231 }
 0xb4f   : > { %v1234_v5 = vmul.f32 %v1232_v57, %v2561_v10  ;;  %v1235_v33 = vmul.f32 %v1232_v57, %v2564_v11  ;;  %v1236_v34 = vmul.f32 %v1232_v57, %v2567_v12 }
 0xb51   : > { %1244 = vrot.lane.b32.xlu2 %v1236_v34, %s2394_s18  ;;  %1242 = vrot.lane.b32.xlu1 %v1235_v33, %s2394_s18 }
 0xb52   : > { %1240 = vrot.lane.b32.xlu0 %v1234_v5, %s2394_s18 }
 0xb5a   : > { %1255 = vperm.xlu0 %2305, %v2503_v2   ;;  %v2417_v2 = vmov 21  }
 0xb5d   : > { %v3033_v61 = vpop.permute.xlu0 %1218  ;;  %v3044_v34 = vpop.permute.xlu1 %1220 }
 0xb5e   : > { %v1222_v23 = vsel %vm384_vm0, %v1217_v4, %v3033_v61 }
 0xb62   : > { %2307 = vset.pattern.permute.xlu0 %v2417_v2 }
 0xbab   : > { %v3042_v5 = vpop.permute.xlu2 %1244 }
 0xbac   : > { %4021 = vst [vmem:[#allocation64_spill] sm:$0xff] %v3042_v5 }
 0xbc4   : > { %v1241_v63 = vpop.permute.xlu0 %1240 }
 0xbcc   : > { %v1256_v19 = vpop.permute.xlu0 %1255 }
 0xbcd   : > { %v1258_v6 = vmul.f32 %v1256_v19, %v2561_v10  ;;  %v1259_v7 = vmul.f32 %v1256_v19, %v2564_v11  ;;  %v1260_v57 = vmul.f32 %v1256_v19, %v2567_v12 }
 0xbcf   : > { %1266 = vrot.lane.b32.xlu2 %v1259_v7, %s2395_s19  ;;  %1264 = vrot.lane.b32.xlu1 %v1258_v6, %s2395_s19 }
 0xbd7   : > { %1279 = vperm.xlu2 %2306, %v2513_v3   ;;  %1268 = vrot.lane.b32.xlu1 %v1260_v57, %s2395_s19  ;;  %v3052_v3 = vpop.permute.xlu1 %1242  ;;  %v1182_v57 = vmul.f32 %v3020_v41, %v2561_v10 }
 0xbd8   : > { %4022 = vst [vmem:[#allocation65_spill] sm:$0xff] %v3052_v3  ;;  %v1246_v25 = vsel %vm384_vm0, %v1241_v63, %v3052_v3  ;;  %v3088_v63 = vld [vmem:[%s2558_s26] sm:$0xff] }
 0xbd9   : > { %v1251_v4 = vadd.f32 %v1246_v25, %v1203_v39  ;;  %v3081_v25 = vld [vmem:[%s2508_s6] sm:$0xff] }
 0xbdf   : > { %2308 = vset.pattern.permute.xlu2 %v2417_v2  ;;  %v3057_v2 = vld [vmem:[%s2500_s28] sm:$0xff] }
 0xc29   : > { %v1267_v33 = vpop.permute.xlu2 %1266 }
 0xc31   : > { %v1280_v51 = vpop.permute.xlu2 %1279 }
 0xc32   : > { %v1282_v7 = vmul.f32 %v1280_v51, %v2561_v10  ;;  %v1283_v6 = vmul.f32 %v1280_v51, %v2564_v11  ;;  %v1284_v19 = vmul.f32 %v1280_v51, %v2567_v12  ;;  %v1189_v51 = vadd.f32 %v3031_v35, %v1182_v57 }
 0xc34   : > { %1292 = vrot.lane.b32.xlu2 %v1284_v19, %s2395_s19  ;;  %1288 = vrot.lane.b32.xlu0 %v1282_v7, %s2395_s19  ;;  %v1227_v29 = vadd.f32 %v1222_v23, %v1189_v51 }
 0xc35   : > { %1290 = vrot.lane.b32.xlu1 %v1283_v6, %s2395_s19 }
 0xc3c   : > { %1303 = vperm.xlu0 %2307, %v3057_v2  }
 0xc41   : > { %v1265_v19 = vpop.permute.xlu1 %1264 }
 0xc42   : > { %v1270_v7 = vsel %vm433_vm1, %v1265_v19, %v1267_v33 }
 0xc43   : > { %v1275_v5 = vadd.f32 %v1270_v7, %v1227_v29 }
 0xc49   : > { %v3064_v6 = vpop.permute.xlu1 %1268 }
 0xca6   : > { %v1289_v21 = vpop.permute.xlu0 %1288 }
 0xca7   : > { %v3071_v38 = vpop.permute.xlu1 %1290 }
 0xca8   : > { %4023 = vst [vmem:[#allocation66_spill] sm:$0xff] %v3071_v38  ;;  %v1294_v23 = vsel %vm433_vm1, %v1289_v21, %v3071_v38  ;;  %v2418_v21 = vmov 22   ;;  %v1223_v38 = vsel %vm384_vm0, %v3033_v61, %v3044_v34 }
 0xca9   : > { %v1299_v57 = vadd.f32 %v1294_v23, %v1251_v4  ;;  %2309 = vset.pattern.permute.xlu0 %v2418_v21  ;;  %v3092_v4 = vld [vmem:[%s2558_s26 + $0x8] sm:$0xff]  ;;  %v3096_v23 = vld [vmem:[%s2558_s26 + $0x10] sm:$0xff] }
 0xcae   : > { %v1304_v29 = vpop.permute.xlu0 %1303 }
 0xcaf   : > { %v1306_v51 = vmul.f32 %v1304_v29, %v2561_v10  ;;  %v1307_v19 = vmul.f32 %v1304_v29, %v2564_v11  ;;  %v1308_v47 = vmul.f32 %v1304_v29, %v2567_v12  ;;  %v3085_v10 = vpop.permute.xlu2 %1292 }
 0xcb0   : > { %4024 = vst [vmem:[#allocation67_spill] sm:$0xff] %v3085_v10 }
 0xcb1   : > { %1314 = vrot.lane.b32.xlu2 %v1307_v19, %s2397_s27  ;;  %1312 = vrot.lane.b32.xlu1 %v1306_v51, %s2397_s27  ;;  %v1183_v51 = vmul.f32 %v3092_v4, %v3020_v41 }
 0xcb9   : > { %1327 = vperm.xlu2 %2308, %v3081_v25   ;;  %1316 = vrot.lane.b32.xlu1 %v1308_v47, %s2397_s27 }
 0xcc1   : > { %2310 = vset.pattern.permute.xlu2 %v2418_v21 }
 0xd0b   : > { %v1315_v39 = vpop.permute.xlu2 %1314 }
 0xd13   : > { %v1328_v11 = vpop.permute.xlu2 %1327 }
 0xd14   : > { %v1330_v7 = vmul.f32 %v3088_v63, %v1328_v11  ;;  %v1331_v12 = vmul.f32 %v3092_v4, %v1328_v11  ;;  %v1332_v29 = vmul.f32 %v3096_v23, %v1328_v11  ;;  %v1190_v11 = vadd.f32 %v3031_v35, %v1183_v51 }
 0xd16   : > { %1340 = vrot.lane.b32.xlu2 %v1332_v29, %s2397_s27  ;;  %1336 = vrot.lane.b32.xlu0 %v1330_v7, %s2397_s27  ;;  %v1271_v7 = vsel %vm433_vm1, %v1267_v33, %v3064_v6  ;;  %v1228_v29 = vadd.f32 %v1223_v38, %v1190_v11 }
 0xd17   : > { %1338 = vrot.lane.b32.xlu1 %v1331_v12, %s2397_s27 }
 0xd18   : > { %v1276_v12 = vadd.f32 %v1271_v7, %v1228_v29 }
 0xd1e   : > { %1351 = vperm.xlu0 %2309, %v3057_v2  }
 0xd23   : > { %v1313_v19 = vpop.permute.xlu1 %1312 }
 0xd24   : > { %v1318_v47 = vsel %vm482_vm2, %v1313_v19, %v1315_v39 }
 0xd25   : > { %v1323_v21 = vadd.f32 %v1318_v47, %v1275_v5 }
 0xd2b   : > { %v3112_v3 = vpop.permute.xlu1 %1316 }
 0xd2c   : > { %v1319_v10 = vsel %vm482_vm2, %v1315_v39, %v3112_v3 }
 0xd2d   : > { %v1324_v9 = vadd.f32 %v1319_v10, %v1276_v12  ;;  %v2419_v10 = vmov 23  }
 0xd2e   : > { %2311 = vset.pattern.permute.xlu0 %v2419_v10 }
 0xd88   : > { %v1337_v26 = vpop.permute.xlu0 %1336 }
 0xd89   : > { %v3116_v19 = vpop.permute.xlu1 %1338 }
 0xd8a   : > { %4025 = vst [vmem:[#allocation68_spill] sm:$0xff] %v3116_v19  ;;  %v1342_v5 = vsel %vm482_vm2, %v1337_v26, %v3116_v19  ;;  %v3127_v26 = vpop.permute.xlu2 %1340 }
 0xd8b   : > { %v1347_v61 = vadd.f32 %v1342_v5, %v1299_v57  ;;  %4026 = vst [vmem:[#allocation69_spill] sm:$0xff] %v3127_v26 }
 0xd90   : > { %v1352_v47 = vpop.permute.xlu0 %1351 }
 0xd91   : > { %v1354_v51 = vmul.f32 %v3088_v63, %v1352_v47  ;;  %v1355_v33 = vmul.f32 %v3092_v4, %v1352_v47  ;;  %v1356_v38 = vmul.f32 %v3096_v23, %v1352_v47 }
 0xd93   : > { %1362 = vrot.lane.b32.xlu2 %v1355_v33, %s2398_s29  ;;  %1360 = vrot.lane.b32.xlu1 %v1354_v51, %s2398_s29 }
 0xd9b   : > { %1375 = vperm.xlu2 %2310, %v3081_v25   ;;  %1364 = vrot.lane.b32.xlu1 %v1356_v38, %s2398_s29 }
 0xda3   : > { %2312 = vset.pattern.permute.xlu2 %v2419_v10 }
 0xded   : > { %v1363_v57 = vpop.permute.xlu2 %1362 }
 0xdf5   : > { %v1376_v39 = vpop.permute.xlu2 %1375 }
 0xdf6   : > { %v1378_v11 = vmul.f32 %v3088_v63, %v1376_v39  ;;  %v1379_v7 = vmul.f32 %v3092_v4, %v1376_v39  ;;  %v1380_v29 = vmul.f32 %v3096_v23, %v1376_v39 }
 0xdf8   : > { %1388 = vrot.lane.b32.xlu2 %v1380_v29, %s2398_s29  ;;  %1384 = vrot.lane.b32.xlu0 %v1378_v11, %s2398_s29 }
 0xdf9   : > { %1386 = vrot.lane.b32.xlu1 %v1379_v7, %s2398_s29 }
 0xe00   : > { %1399 = vperm.xlu0 %2311, %v3057_v2  }
 0xe05   : > { %v1361_v12 = vpop.permute.xlu1 %1360 }
 0xe06   : > { %v1366_v5 = vsel %vm531_vm3, %v1361_v12, %v1363_v57 }
 0xe07   : > { %v1371_v47 = vadd.f32 %v1366_v5, %v1323_v21 }
 0xe0d   : > { %v3137_v51 = vpop.permute.xlu1 %1364 }
 0xe0e   : > { %4027 = vst [vmem:[#allocation70_spill] sm:$0xff] %v3137_v51  ;;  %v1367_v33 = vsel %vm531_vm3, %v1363_v57, %v3137_v51 }
 0xe0f   : > { %v1372_v38 = vadd.f32 %v1367_v33, %v1324_v9  ;;  %v2420_v9 = vmov 24  }
 0xe10   : > { %2313 = vset.pattern.permute.xlu0 %v2420_v9 }
 0xe52   : > { %v3152_v57 = vpop.permute.xlu2 %1388 }
 0xe53   : > { %4029 = vst [vmem:[#allocation72_spill] sm:$0xff] %v3152_v57 }
 0xe6a   : > { %v1385_v10 = vpop.permute.xlu0 %1384 }
 0xe6b   : > { %v3141_v39 = vpop.permute.xlu1 %1386 }
 0xe6c   : > { %4028 = vst [vmem:[#allocation71_spill] sm:$0xff] %v3141_v39  ;;  %v1390_v11 = vsel %vm531_vm3, %v1385_v10, %v3141_v39 }
 0xe6d   : > { %v1395_v29 = vadd.f32 %v1390_v11, %v1347_v61 }
 0xe72   : > { %v1400_v7 = vpop.permute.xlu0 %1399 }
 0xe73   : > { %v1402_v19 = vmul.f32 %v3088_v63, %v1400_v7  ;;  %v1403_v26 = vmul.f32 %v3092_v4, %v1400_v7  ;;  %v1404_v21 = vmul.f32 %v3096_v23, %v1400_v7 }
 0xe75   : > { %1410 = vrot.lane.b32.xlu2 %v1403_v26, %s2399_s30  ;;  %1408 = vrot.lane.b32.xlu1 %v1402_v19, %s2399_s30 }
 0xe7d   : > { %1423 = vperm.xlu2 %2312, %v3081_v25   ;;  %1412 = vrot.lane.b32.xlu1 %v1404_v21, %s2399_s30 }
 0xe85   : > { %2314 = vset.pattern.permute.xlu2 %v2420_v9 }
 0xecf   : > { %v1411_v61 = vpop.permute.xlu2 %1410 }
 0xed7   : > { %v1424_v12 = vpop.permute.xlu2 %1423 }
 0xed8   : > { %v1426_v5 = vmul.f32 %v3088_v63, %v1424_v12  ;;  %v1427_v33 = vmul.f32 %v3092_v4, %v1424_v12  ;;  %v1428_v26 = vmul.f32 %v3096_v23, %v1424_v12 }
 0xeda   : > { %1436 = vrot.lane.b32.xlu2 %v1428_v26, %s2399_s30  ;;  %1432 = vrot.lane.b32.xlu0 %v1426_v5, %s2399_s30 }
 0xedb   : > { %1434 = vrot.lane.b32.xlu1 %v1427_v33, %s2399_s30 }
 0xee2   : > { %1447 = vperm.xlu0 %2313, %v3057_v2  }
 0xee7   : > { %v1409_v19 = vpop.permute.xlu1 %1408 }
 0xee8   : > { %v1414_v10 = vsel %vm580_vm4, %v1409_v19, %v1411_v61 }
 0xee9   : > { %v1419_v11 = vadd.f32 %v1414_v10, %v1371_v47 }
 0xeef   : > { %v3162_v7 = vpop.permute.xlu1 %1412 }
 0xef0   : > { %4030 = vst [vmem:[#allocation73_spill] sm:$0xff] %v3162_v7  ;;  %v1415_v21 = vsel %vm580_vm4, %v1411_v61, %v3162_v7 }
 0xef1   : > { %v1420_v9 = vadd.f32 %v1415_v21, %v1372_v38  ;;  %v2421_v38 = vmov 25  }
 0xef2   : > { %2315 = vset.pattern.permute.xlu0 %v2421_v38 }
 0xf4c   : > { %v1433_v39 = vpop.permute.xlu0 %1432 }
 0xf4d   : > { %v3166_v12 = vpop.permute.xlu1 %1434 }
 0xf4e   : > { %4031 = vst [vmem:[#allocation74_spill] sm:$0xff] %v3166_v12  ;;  %v1438_v5 = vsel %vm580_vm4, %v1433_v39, %v3166_v12  ;;  %v3177_v39 = vpop.permute.xlu2 %1436 }
 0xf4f   : > { %v1443_v26 = vadd.f32 %v1438_v5, %v1395_v29  ;;  %4032 = vst [vmem:[#allocation75_spill] sm:$0xff] %v3177_v39 }
 0xf54   : > { %v1448_v33 = vpop.permute.xlu0 %1447 }
 0xf55   : > { %v1450_v57 = vmul.f32 %v3088_v63, %v1448_v33  ;;  %v1451_v51 = vmul.f32 %v3092_v4, %v1448_v33  ;;  %v1452_v47 = vmul.f32 %v3096_v23, %v1448_v33 }
 0xf57   : > { %1458 = vrot.lane.b32.xlu2 %v1451_v51, %s2400_s7  ;;  %1456 = vrot.lane.b32.xlu1 %v1450_v57, %s2400_s7 }
 0xf5f   : > { %1471 = vperm.xlu2 %2314, %v3081_v25   ;;  %1460 = vrot.lane.b32.xlu1 %v1452_v47, %s2400_s7 }
 0xf67   : > { %2316 = vset.pattern.permute.xlu2 %v2421_v38 }
 0xfb1   : > { %v1459_v29 = vpop.permute.xlu2 %1458 }
 0xfb9   : > { %v1472_v61 = vpop.permute.xlu2 %1471 }
 0xfba   : > { %v1474_v19 = vmul.f32 %v3088_v63, %v1472_v61  ;;  %v1475_v10 = vmul.f32 %v3092_v4, %v1472_v61  ;;  %v1476_v51 = vmul.f32 %v3096_v23, %v1472_v61 }
 0xfbc   : > { %1484 = vrot.lane.b32.xlu2 %v1476_v51, %s2400_s7  ;;  %1480 = vrot.lane.b32.xlu0 %v1474_v19, %s2400_s7 }
 0xfbd   : > { %1482 = vrot.lane.b32.xlu1 %v1475_v10, %s2400_s7 }
 0xfc4   : > { %1495 = vperm.xlu0 %2315, %v3057_v2  }
 0xfc9   : > { %v1457_v57 = vpop.permute.xlu1 %1456 }
 0xfca   : > { %v1462_v21 = vsel %vm629_vm5, %v1457_v57, %v1459_v29 }
 0xfcb   : > { %v1467_v5 = vadd.f32 %v1462_v21, %v1419_v11 }
 0xfd1   : > { %v3187_v33 = vpop.permute.xlu1 %1460 }
 0xfd2   : > { %4033 = vst [vmem:[#allocation76_spill] sm:$0xff] %v3187_v33  ;;  %v1463_v47 = vsel %vm629_vm5, %v1459_v29, %v3187_v33  ;;  %v2429_v33 = vmov 33  }
 0xfd3   : > { %v1468_v38 = vadd.f32 %v1463_v47, %v1420_v9  ;;  %v2422_v9 = vmov 26  }
 0xfd4   : > { %2317 = vset.pattern.permute.xlu0 %v2422_v9 }
0x102e   : > { %v1481_v12 = vpop.permute.xlu0 %1480 }
0x102f   : > { %v3191_v61 = vpop.permute.xlu1 %1482 }
0x1030   : > { %4034 = vst [vmem:[#allocation77_spill] sm:$0xff] %v3191_v61  ;;  %v1486_v19 = vsel %vm629_vm5, %v1481_v12, %v3191_v61  ;;  %v3202_v12 = vpop.permute.xlu2 %1484 }
0x1031   : > { %v1491_v51 = vadd.f32 %v1486_v19, %v1443_v26  ;;  %4035 = vst [vmem:[#allocation78_spill] sm:$0xff] %v3202_v12 }
0x1036   : > { %v1496_v10 = vpop.permute.xlu0 %1495 }
0x1037   : > { %v1498_v39 = vmul.f32 %v3088_v63, %v1496_v10  ;;  %v1499_v7 = vmul.f32 %v3092_v4, %v1496_v10  ;;  %v1500_v11 = vmul.f32 %v3096_v23, %v1496_v10 }
0x1039   : > { %1506 = vrot.lane.b32.xlu2 %v1499_v7, %s2402_s8  ;;  %1504 = vrot.lane.b32.xlu1 %v1498_v39, %s2402_s8 }
0x1041   : > { %1519 = vperm.xlu2 %2316, %v3081_v25   ;;  %1508 = vrot.lane.b32.xlu1 %v1500_v11, %s2402_s8 }
0x1049   : > { %2318 = vset.pattern.permute.xlu2 %v2422_v9 }
0x1093   : > { %v1507_v26 = vpop.permute.xlu2 %1506 }
0x109b   : > { %v1520_v29 = vpop.permute.xlu2 %1519 }
0x109c   : > { %v1522_v57 = vmul.f32 %v3088_v63, %v1520_v29  ;;  %v1523_v21 = vmul.f32 %v3092_v4, %v1520_v29  ;;  %v1524_v7 = vmul.f32 %v3096_v23, %v1520_v29 }
0x109e   : > { %1532 = vrot.lane.b32.xlu2 %v1524_v7, %s2402_s8  ;;  %1528 = vrot.lane.b32.xlu0 %v1522_v57, %s2402_s8 }
0x109f   : > { %1530 = vrot.lane.b32.xlu1 %v1523_v21, %s2402_s8 }
0x10a6   : > { %1543 = vperm.xlu0 %2317, %v3057_v2  }
0x10ab   : > { %v1505_v39 = vpop.permute.xlu1 %1504 }
0x10ac   : > { %v1510_v47 = vsel %vm678_vm6, %v1505_v39, %v1507_v26 }
0x10ad   : > { %v1515_v19 = vadd.f32 %v1510_v47, %v1467_v5  ;;  %v385_v47 = vsel %vm384_vm0, %v2646_v62, %v2630_v54 }
0x10b3   : > { %v3212_v10 = vpop.permute.xlu1 %1508 }
0x10b4   : > { %4036 = vst [vmem:[#allocation79_spill] sm:$0xff] %v3212_v10  ;;  %v1511_v11 = vsel %vm678_vm6, %v1507_v26, %v3212_v10  ;;  %v341_v26 = vmul.f32 %v3088_v63, %v2583_v24 }
0x10b5   : > { %v1516_v9 = vadd.f32 %v1511_v11, %v1468_v38  ;;  %v2423_v38 = vmov 27  }
0x10b6   : > { %2319 = vset.pattern.permute.xlu0 %v2423_v38 }
0x1110   : > { %v1529_v61 = vpop.permute.xlu0 %1528 }
0x1111   : > { %v3216_v29 = vpop.permute.xlu1 %1530 }
0x1112   : > { %4037 = vst [vmem:[#allocation80_spill] sm:$0xff] %v3216_v29  ;;  %v1534_v57 = vsel %vm678_vm6, %v1529_v61, %v3216_v29  ;;  %v3229_v61 = vpop.permute.xlu2 %1532  ;;  %v483_v29 = vsel %vm482_vm2, %v2775_v52, %v2661_v15  ;;  %v630_v52 = vsel %vm629_vm5, %v2800_v40, %v2673_v22 }
0x1113   : > { %v3220_v7 = vadd.f32 %v1534_v57, %v1491_v51  ;;  %4038 = vst [vmem:[#allocation81_spill] sm:$0xff] %v3229_v61  ;;  %v434_v57 = vsel %vm433_vm1, %v2769_v46, %v2657_v13  ;;  %v532_v46 = vsel %vm531_vm3, %v2786_v30, %v2665_v17  ;;  %v2428_v61 = vmov 32  }
0x1118   : > { %v1544_v21 = vpop.permute.xlu0 %1543 }
0x1119   : > { %v1546_v12 = vmul.f32 %v3088_v63, %v1544_v21  ;;  %v1547_v39 = vmul.f32 %v3092_v4, %v1544_v21  ;;  %v1548_v5 = vmul.f32 %v3096_v23, %v1544_v21 }
0x111b   : > { %1554 = vrot.lane.b32.xlu2 %v1547_v39, %s2404_s10  ;;  %1552 = vrot.lane.b32.xlu1 %v1546_v12, %s2404_s10  ;;  %v349_v12 = vadd.f32 %v2587_v27, %v341_v26 }
0x1123   : > { %1567 = vperm.xlu2 %2318, %v3081_v25   ;;  %1556 = vrot.lane.b32.xlu1 %v1548_v5, %s2404_s10 }
0x112b   : > { %2321 = vset.pattern.permute.xlu2 %v2423_v38  ;;  %v390_v38 = vadd.f32 %v385_v47, %v349_v12  ;;  %v581_v47 = vsel %vm580_vm4, %v2794_v37, %v2669_v20  ;;  %v728_v37 = vsel %vm727_vm7, %v2823_v0, %v2713_v48 }
0x112d   : > { %v439_v62 = vadd.f32 %v434_v57, %v390_v38  ;;  %v679_v57 = vsel %vm678_vm6, %v2810_v28, %v2693_v36 }
0x112f   : > { %v488_v26 = vadd.f32 %v483_v29, %v439_v62  ;;  %v2344_v29 = vld [vmem:[%s2519_s9] sm:$0xff]  ;;  %v2424_v62 = vmov 28   ;;  %s3746_s9 = scalar_lea.vmem %s3873_s5, %s2169_s16 }
0x1131   : > { %v537_v12 = vadd.f32 %v532_v46, %v488_v26  ;;  %v2345_v26 = vld [vmem:[%s2529_s12] sm:$0xff] }
0x1175   : > { %v1555_v51 = vpop.permute.xlu2 %1554 }
0x117d   : > { %v1568_v11 = vpop.permute.xlu2 %1567 }
0x117e   : > { %v1570_v21 = vmul.f32 %v3088_v63, %v1568_v11  ;;  %v1571_v39 = vmul.f32 %v3092_v4, %v1568_v11  ;;  %v1572_v5 = vmul.f32 %v3096_v23, %v1568_v11  ;;  %v586_v11 = vadd.f32 %v581_v47, %v537_v12 }
0x1180   : > { %1580 = vrot.lane.b32.xlu2 %v1572_v5, %s2404_s10  ;;  %1576 = vrot.lane.b32.xlu0 %v1570_v21, %s2404_s10  ;;  %v635_v30 = vadd.f32 %v630_v52, %v586_v11 }
0x1181   : > { %1578 = vrot.lane.b32.xlu1 %v1571_v39, %s2404_s10 }
0x1182   : > { %v684_v21 = vadd.f32 %v679_v57, %v635_v30 }
0x1184   : > { %v733_v39 = vadd.f32 %v728_v37, %v684_v21 }
0x1186   : > { %v1172_v38 = vmax.f32 %v733_v39, %v2989_v55  ;;  %v2425_v39 = vmov 29  }
0x1188   : > { %1611 = vperm.xlu2 %2321, %v3081_v25   ;;  %1597 = vperm.xlu0 %2319, %v3057_v2  }
0x1189   : > { %1604 = vperm.xlu1 %2320, %v2344_v29  }
0x118d   : > { %v1553_v40 = vpop.permute.xlu1 %1552 }
0x118e   : > { %v1558_v5 = vsel %vm727_vm7, %v1553_v40, %v1555_v51 }
0x118f   : > { %v1563_v28 = vadd.f32 %v1558_v5, %v1515_v19 }
0x1190   : > { %2322 = vset.pattern.permute.xlu2 %v2424_v62  ;;  %2323 = vset.pattern.permute.xlu0 %v2424_v62 }
0x1191   : > { %v3269_v46 = vmax.f32 %v1172_v38, %v1563_v28  ;;  %1618 = vperm.xlu1 %2320, %v2345_v26   ;;  %1625 = vperm.xlu2 %2322, %v3057_v2  }
0x1193   : > { %4039 = vst [vmem:[#allocation82_spill] sm:$0xff] %v3269_v46 }
0x1195   : > { %v3273_v47 = vpop.permute.xlu1 %1556 }
0x1196   : > { %4040 = vst [vmem:[#allocation83_spill] sm:$0xff] %v3273_v47  ;;  %v1559_v0 = vsel %vm727_vm7, %v1555_v51, %v3273_v47 }
0x1197   : > { %v3277_v12 = vadd.f32 %v1559_v0, %v1516_v9 }
0x1199   : > { %4041 = vst [vmem:[#allocation84_spill] sm:$0xff] %v3277_v12  ;;  %2324 = vset.pattern.permute.xlu2 %v2425_v39 }
0x11da   : > { %v3279_v52 = vpop.permute.xlu2 %1580 }
0x11db   : > { %4042 = vst [vmem:[#allocation85_spill] sm:$0xff] %v3279_v52 }
0x11e2   : > { %v3281_v55 = vpop.permute.xlu2 %1611 }
0x11eb   : > { %v1626_v19 = vpop.permute.xlu2 %1625 }
0x11ec   : > { %v1628_v11 = vmul.f32 %v3088_v63, %v1626_v19  ;;  %v1629_v57 = vmul.f32 %v3092_v4, %v1626_v19  ;;  %v1630_v30 = vmul.f32 %v3096_v23, %v1626_v19 }
0x11ee   : > { %1638 = vrot.lane.b32.xlu2 %v1630_v30, %s2394_s18  ;;  %1634 = vrot.lane.b32.xlu0 %v1628_v11, %s2394_s18 }
0x11ef   : > { %1636 = vrot.lane.b32.xlu1 %v1629_v57, %s2394_s18 }
0x11f2   : > { %v1577_v51 = vpop.permute.xlu0 %1576 }
0x11f3   : > { %v1579_v9 = vpop.permute.xlu1 %1578 }
0x11f4   : > { %v1582_v29 = vsel %vm727_vm7, %v1577_v51, %v1579_v9  ;;  %v3292_v37 = vsel %vm727_vm7, %v1579_v9, %v3279_v52  ;;  %v2427_v52 = vmov 31  }
0x11f5   : > { %4043 = vst [vmem:[#allocation86_spill] sm:$0xff] %v3292_v37  ;;  %v3295_v21 = vadd.f32 %v1582_v29, %v3220_v7  ;;  %v2426_v37 = vmov 30  }
0x11f6   : > { %1649 = vperm.xlu0 %2323, %v3081_v25  }
0x11f7   : > { %4044 = vst [vmem:[#allocation87_spill] sm:$0xff] %v3295_v21 }
0x11fa   : > { %v3300_v5 = vpop.permute.xlu0 %1597 }
0x11fb   : > { %v3298_v40 = vpop.permute.xlu1 %1604  ;;  %v1600_v28 = vmul.f32 %v3088_v63, %v3300_v5 }
0x11fd   : > { %v1607_v26 = vadd.f32 %v3298_v40, %v1600_v28 }
0x11fe   : > { %2325 = vset.pattern.permute.xlu0 %v2425_v39 }
0x1203   : > { %v3302_v38 = vpop.permute.xlu1 %1618 }
0x1248   : > { %v3318_v9 = vpop.permute.xlu2 %1638 }
0x1260   : > { %v1635_v62 = vpop.permute.xlu0 %1634 }
0x1261   : > { %v3307_v0 = vpop.permute.xlu1 %1636 }
0x1262   : > { %4045 = vst [vmem:[#allocation88_spill] sm:$0xff] %v3307_v0  ;;  %v1640_v7 = vsel %vm384_vm0, %v1635_v62, %v3307_v0 }
0x1263   : > { %v1645_v19 = vadd.f32 %v1640_v7, %v1607_v26  ;;  %v1614_v7 = vmul.f32 %v3088_v63, %v3281_v55 }
0x1268   : > { %v1650_v11 = vpop.permute.xlu0 %1649 }
0x1269   : > { %v1652_v57 = vmul.f32 %v3088_v63, %v1650_v11  ;;  %v1653_v30 = vmul.f32 %v3092_v4, %v1650_v11  ;;  %v1654_v51 = vmul.f32 %v3096_v23, %v1650_v11  ;;  %v1621_v11 = vadd.f32 %v3302_v38, %v1614_v7 }
0x126b   : > { %1660 = vrot.lane.b32.xlu2 %v1653_v30, %s2394_s18  ;;  %1658 = vrot.lane.b32.xlu1 %v1652_v57, %s2394_s18 }
0x1273   : > { %1673 = vperm.xlu2 %2324, %v3057_v2   ;;  %1662 = vrot.lane.b32.xlu1 %v1654_v51, %s2394_s18 }
0x127b   : > { %2326 = vset.pattern.permute.xlu2 %v2426_v37 }
0x12c5   : > { %v1661_v29 = vpop.permute.xlu2 %1660 }
0x12cd   : > { %v1674_v39 = vpop.permute.xlu2 %1673 }
0x12ce   : > { %v1676_v28 = vmul.f32 %v3088_v63, %v1674_v39  ;;  %v1677_v62 = vmul.f32 %v3092_v4, %v1674_v39  ;;  %v1678_v26 = vmul.f32 %v3096_v23, %v1674_v39  ;;  %v1615_v39 = vmul.f32 %v3092_v4, %v3281_v55 }
0x12d0   : > { %1686 = vrot.lane.b32.xlu2 %v1678_v26, %s2395_s19  ;;  %1682 = vrot.lane.b32.xlu0 %v1676_v28, %s2395_s19  ;;  %v1622_v26 = vadd.f32 %v3302_v38, %v1615_v39 }
0x12d1   : > { %1684 = vrot.lane.b32.xlu1 %v1677_v62, %s2395_s19 }
0x12d8   : > { %1697 = vperm.xlu0 %2325, %v3081_v25  }
0x12dd   : > { %v1659_v57 = vpop.permute.xlu1 %1658 }
0x12de   : > { %v1664_v30 = vsel %vm384_vm0, %v1659_v57, %v1661_v29 }
0x12df   : > { %v1669_v51 = vadd.f32 %v1664_v30, %v1621_v11 }
0x12e0   : > { %2327 = vset.pattern.permute.xlu0 %v2426_v37 }
0x12e5   : > { %v3334_v21 = vpop.permute.xlu1 %1662 }
0x12e6   : > { %v1665_v28 = vsel %vm384_vm0, %v1661_v29, %v3334_v21 }
0x12e7   : > { %v1670_v62 = vadd.f32 %v1665_v28, %v1622_v26 }
0x132a   : > { %v3349_v37 = vpop.permute.xlu2 %1686 }
0x1342   : > { %v1683_v46 = vpop.permute.xlu0 %1682 }
0x1343   : > { %v3338_v7 = vpop.permute.xlu1 %1684 }
0x1344   : > { %4046 = vst [vmem:[#allocation89_spill] sm:$0xff] %v3338_v7  ;;  %v1688_v11 = vsel %vm433_vm1, %v1683_v46, %v3338_v7 }
0x1345   : > { %v1693_v57 = vadd.f32 %v1688_v11, %v1645_v19 }
0x134a   : > { %v1698_v30 = vpop.permute.xlu0 %1697 }
0x134b   : > { %v1700_v12 = vmul.f32 %v3088_v63, %v1698_v30  ;;  %v1701_v39 = vmul.f32 %v3092_v4, %v1698_v30  ;;  %v1702_v29 = vmul.f32 %v3096_v23, %v1698_v30 }
0x134d   : > { %1708 = vrot.lane.b32.xlu2 %v1701_v39, %s2395_s19  ;;  %1706 = vrot.lane.b32.xlu1 %v1700_v12, %s2395_s19 }
0x1355   : > { %1721 = vperm.xlu2 %2326, %v3057_v2   ;;  %1710 = vrot.lane.b32.xlu1 %v1702_v29, %s2395_s19 }
0x135d   : > { %2328 = vset.pattern.permute.xlu2 %v2427_v52 }
0x13a7   : > { %v1709_v26 = vpop.permute.xlu2 %1708 }
0x13af   : > { %v1722_v46 = vpop.permute.xlu2 %1721 }
0x13b0   : > { %v1724_v19 = vmul.f32 %v3088_v63, %v1722_v46  ;;  %v1725_v28 = vmul.f32 %v3092_v4, %v1722_v46  ;;  %v1726_v11 = vmul.f32 %v3096_v23, %v1722_v46 }
0x13b2   : > { %1734 = vrot.lane.b32.xlu2 %v1726_v11, %s2397_s27  ;;  %1730 = vrot.lane.b32.xlu0 %v1724_v19, %s2397_s27 }
0x13b3   : > { %1732 = vrot.lane.b32.xlu1 %v1725_v28, %s2397_s27 }
0x13ba   : > { %1745 = vperm.xlu0 %2327, %v3081_v25  }
0x13bf   : > { %v1707_v12 = vpop.permute.xlu1 %1706 }
0x13c0   : > { %v1712_v30 = vsel %vm433_vm1, %v1707_v12, %v1709_v26 }
0x13c1   : > { %v1717_v39 = vadd.f32 %v1712_v30, %v1669_v51 }
0x13c2   : > { %2329 = vset.pattern.permute.xlu0 %v2427_v52 }
0x13c7   : > { %v3359_v29 = vpop.permute.xlu1 %1710 }
0x13c8   : > { %v1713_v7 = vsel %vm433_vm1, %v1709_v26, %v3359_v29 }
0x13c9   : > { %v1718_v0 = vadd.f32 %v1713_v7, %v1670_v62 }
0x140c   : > { %v3374_v52 = vpop.permute.xlu2 %1734 }
0x1424   : > { %v1731_v46 = vpop.permute.xlu0 %1730 }
0x1425   : > { %v3363_v11 = vpop.permute.xlu1 %1732 }
0x1426   : > { %4047 = vst [vmem:[#allocation90_spill] sm:$0xff] %v3363_v11  ;;  %v1736_v19 = vsel %vm482_vm2, %v1731_v46, %v3363_v11 }
0x1427   : > { %v1741_v28 = vadd.f32 %v1736_v19, %v1693_v57 }
0x142c   : > { %v1746_v47 = vpop.permute.xlu0 %1745 }
0x142d   : > { %v1748_v12 = vmul.f32 %v3088_v63, %v1746_v47  ;;  %v1749_v51 = vmul.f32 %v3092_v4, %v1746_v47  ;;  %v1750_v62 = vmul.f32 %v3096_v23, %v1746_v47 }
0x142f   : > { %1756 = vrot.lane.b32.xlu2 %v1749_v51, %s2397_s27  ;;  %1754 = vrot.lane.b32.xlu1 %v1748_v12, %s2397_s27 }
0x1437   : > { %1769 = vperm.xlu2 %2328, %v3057_v2   ;;  %1758 = vrot.lane.b32.xlu1 %v1750_v62, %s2397_s27 }
0x143f   : > { %2330 = vset.pattern.permute.xlu2 %v2428_v61 }
0x1489   : > { %v1757_v7 = vpop.permute.xlu2 %1756 }
0x1491   : > { %v1770_v26 = vpop.permute.xlu2 %1769 }
0x1492   : > { %v1772_v57 = vmul.f32 %v3088_v63, %v1770_v26  ;;  %v1773_v30 = vmul.f32 %v3092_v4, %v1770_v26  ;;  %v1774_v46 = vmul.f32 %v3096_v23, %v1770_v26 }
0x1494   : > { %1782 = vrot.lane.b32.xlu2 %v1774_v46, %s2398_s29  ;;  %1778 = vrot.lane.b32.xlu0 %v1772_v57, %s2398_s29 }
0x1495   : > { %1780 = vrot.lane.b32.xlu1 %v1773_v30, %s2398_s29 }
0x149c   : > { %1793 = vperm.xlu0 %2329, %v3081_v25  }
0x14a1   : > { %v1755_v47 = vpop.permute.xlu1 %1754 }
0x14a2   : > { %v1760_v19 = vsel %vm482_vm2, %v1755_v47, %v1757_v7 }
0x14a3   : > { %v1765_v12 = vadd.f32 %v1760_v19, %v1717_v39 }
0x14a4   : > { %2331 = vset.pattern.permute.xlu0 %v2428_v61 }
0x14a9   : > { %v3384_v51 = vpop.permute.xlu1 %1758 }
0x14aa   : > { %v1761_v62 = vsel %vm482_vm2, %v1757_v7, %v3384_v51 }
0x14ab   : > { %v1766_v11 = vadd.f32 %v1761_v62, %v1718_v0 }
0x14ee   : > { %v3399_v61 = vpop.permute.xlu2 %1782 }
0x1506   : > { %v1779_v26 = vpop.permute.xlu0 %1778 }
0x1507   : > { %v3388_v46 = vpop.permute.xlu1 %1780 }
0x1508   : > { %4048 = vst [vmem:[#allocation91_spill] sm:$0xff] %v3388_v46  ;;  %v1784_v57 = vsel %vm531_vm3, %v1779_v26, %v3388_v46 }
0x1509   : > { %v1789_v30 = vadd.f32 %v1784_v57, %v1741_v28 }
0x150e   : > { %v1794_v10 = vpop.permute.xlu0 %1793 }
0x150f   : > { %v1796_v47 = vmul.f32 %v3088_v63, %v1794_v10  ;;  %v1797_v39 = vmul.f32 %v3092_v4, %v1794_v10  ;;  %v1798_v0 = vmul.f32 %v3096_v23, %v1794_v10 }
0x1511   : > { %1804 = vrot.lane.b32.xlu2 %v1797_v39, %s2398_s29  ;;  %1802 = vrot.lane.b32.xlu1 %v1796_v47, %s2398_s29 }
0x1519   : > { %1817 = vperm.xlu2 %2330, %v3057_v2   ;;  %1806 = vrot.lane.b32.xlu1 %v1798_v0, %s2398_s29 }
0x1521   : > { %2332 = vset.pattern.permute.xlu2 %v2429_v33 }
0x156b   : > { %v1805_v7 = vpop.permute.xlu2 %1804 }
0x1573   : > { %v1818_v19 = vpop.permute.xlu2 %1817 }
0x1574   : > { %v1820_v28 = vmul.f32 %v3088_v63, %v1818_v19  ;;  %v1821_v62 = vmul.f32 %v3092_v4, %v1818_v19  ;;  %v1822_v26 = vmul.f32 %v3096_v23, %v1818_v19  ;;  %v2430_v19 = vmov 34  }
0x1575   : > { %2334 = vset.pattern.permute.xlu1 %v2430_v19 }
0x1576   : > { %1830 = vrot.lane.b32.xlu2 %v1822_v26, %s2399_s30  ;;  %1826 = vrot.lane.b32.xlu0 %v1820_v28, %s2399_s30  ;;  %v2431_v28 = vmov 35  }
0x1577   : > { %1828 = vrot.lane.b32.xlu1 %v1821_v62, %s2399_s30 }
0x157e   : > { %1841 = vperm.xlu0 %2331, %v3081_v25  }
0x1583   : > { %v1803_v10 = vpop.permute.xlu1 %1802 }
0x1584   : > { %v1808_v57 = vsel %vm531_vm3, %v1803_v10, %v1805_v7 }
0x1585   : > { %v1813_v47 = vadd.f32 %v1808_v57, %v1765_v12 }
0x1586   : > { %2333 = vset.pattern.permute.xlu0 %v2429_v33 }
0x1587   : > { %1889 = vperm.xlu0 %2333, %v3081_v25  }
0x158b   : > { %v1807_v39 = vpop.permute.xlu1 %1806 }
0x158c   : > { %v1809_v0 = vsel %vm531_vm3, %v1805_v7, %v1807_v39 }
0x158d   : > { %v1814_v46 = vadd.f32 %v1809_v0, %v1766_v11 }
0x158f   : > { %2338 = vset.pattern.permute.xlu0 %v2431_v28 }
0x15e8   : > { %v1827_v62 = vpop.permute.xlu0 %1826 }
0x15e9   : > { %v3411_v26 = vpop.permute.xlu1 %1828 }
0x15ea   : > { %4049 = vst [vmem:[#allocation92_spill] sm:$0xff] %v3411_v26  ;;  %v1832_v10 = vsel %vm580_vm4, %v1827_v62, %v3411_v26 }
0x15eb   : > { %v3415_v12 = vadd.f32 %v1832_v10, %v1789_v30  ;;  %v3428_v30 = vpop.permute.xlu2 %1830 }
0x15ed   : > { %4050 = vst [vmem:[#allocation93_spill] sm:$0xff] %v3415_v12 }
0x15f0   : > { %v1842_v57 = vpop.permute.xlu0 %1841 }
0x15f1   : > { %v1844_v11 = vmul.f32 %v3088_v63, %v1842_v57  ;;  %v1845_v7 = vmul.f32 %v3092_v4, %v1842_v57  ;;  %v1846_v33 = vmul.f32 %v3096_v23, %v1842_v57 }
0x15f3   : > { %1852 = vrot.lane.b32.xlu2 %v1845_v7, %s2399_s30  ;;  %1850 = vrot.lane.b32.xlu1 %v1844_v11, %s2399_s30  ;;  %v1616_v7 = vmul.f32 %v3096_v23, %v3281_v55 }
0x15fb   : > { %1865 = vperm.xlu2 %2332, %v3057_v2   ;;  %1854 = vrot.lane.b32.xlu1 %v1846_v33, %s2399_s30  ;;  %v1623_v33 = vadd.f32 %v3302_v38, %v1616_v7 }
0x1603   : > { %1913 = vperm.xlu1 %2334, %v3057_v2   ;;  %2335 = vset.pattern.permute.xlu2 %v2430_v19 }
0x1604   : > { %1937 = vperm.xlu2 %2335, %v3081_v25  }
0x160b   : > { %2336 = vset.pattern.permute.xlu1 %v2431_v28 }
0x160c   : > { %1961 = vperm.xlu1 %2336, %v3057_v2   ;;  %2337 = vset.pattern.permute.xlu2 %v2431_v28  ;;  %v1890_v2 = vpop.permute.xlu0 %1889 }
0x160d   : > { %1985 = vperm.xlu2 %2337, %v3081_v25   ;;  %v1892_v19 = vmul.f32 %v3088_v63, %v1890_v2  ;;  %v1894_v25 = vmul.f32 %v3096_v23, %v1890_v2  ;;  %v1893_v28 = vmul.f32 %v3092_v4, %v1890_v2 }
0x164d   : > { %v1853_v0 = vpop.permute.xlu2 %1852 }
0x1655   : > { %v1866_v62 = vpop.permute.xlu2 %1865 }
0x1656   : > { %v1868_v10 = vmul.f32 %v3088_v63, %v1866_v62  ;;  %v1869_v57 = vmul.f32 %v3092_v4, %v1866_v62  ;;  %v1870_v11 = vmul.f32 %v3096_v23, %v1866_v62 }
0x1658   : > { %1878 = vrot.lane.b32.xlu2 %v1870_v11, %s2400_s7  ;;  %1874 = vrot.lane.b32.xlu0 %v1868_v10, %s2400_s7  ;;  %v1671_v10 = vadd.f32 %v3334_v21, %v1623_v33 }
0x1659   : > { %1876 = vrot.lane.b32.xlu1 %v1869_v57, %s2400_s7 }
0x165a   : > { %v1719_v2 = vadd.f32 %v3359_v29, %v1671_v10 }
0x165e   : > { %v1938_v29 = vpop.permute.xlu2 %1937 }
0x1660   : > { %1902 = vrot.lane.b32.xlu2 %v1894_v25, %s2400_s7  ;;  %1898 = vrot.lane.b32.xlu0 %v1892_v19, %s2400_s7  ;;  %v1767_v25 = vadd.f32 %v3384_v51, %v1719_v2  ;;  %v1941_v51 = vmul.f32 %v3092_v4, %v1938_v29 }
0x1661   : > { %1900 = vrot.lane.b32.xlu1 %v1893_v28, %s2400_s7 }
0x1662   : > { %v1815_v12 = vadd.f32 %v1807_v39, %v1767_v25  ;;  %v1942_v39 = vmul.f32 %v3096_v23, %v1938_v29 }
0x1665   : > { %v1851_v62 = vpop.permute.xlu1 %1850 }
0x1666   : > { %v1856_v57 = vsel %vm580_vm4, %v1851_v62, %v1853_v0 }
0x1667   : > { %v3447_v11 = vadd.f32 %v1856_v57, %v1813_v47  ;;  %v1986_v10 = vpop.permute.xlu2 %1985 }
0x1668   : > { %v1989_v57 = vmul.f32 %v3092_v4, %v1986_v10  ;;  %v1990_v2 = vmul.f32 %v3096_v23, %v1986_v10  ;;  %v1988_v25 = vmul.f32 %v3088_v63, %v1986_v10 }
0x1669   : > { %4051 = vst [vmem:[#allocation94_spill] sm:$0xff] %v3447_v11  ;;  %v4098_v11 = vld [vmem:[#allocation73_spill] sm:$0xff] }
0x166d   : > { %v1855_v19 = vpop.permute.xlu1 %1854 }
0x166e   : > { %v1857_v28 = vsel %vm580_vm4, %v1853_v0, %v1855_v19  ;;  %v3452_v26 = vadd.f32 %v1855_v19, %v1815_v12  ;;  %v359_v19 = vmul.f32 %v3096_v23, %v2761_v42 }
0x166f   : > { %v3454_v55 = vadd.f32 %v1857_v28, %v1814_v46  ;;  %v1940_v46 = vmul.f32 %v3088_v63, %v1938_v29  ;;  %v342_v29 = vmul.f32 %v3092_v4, %v2583_v24 }
0x1671   : > { %4052 = vst [vmem:[#allocation95_spill] sm:$0xff] %v3454_v55 }
0x1675   : > { %v1914_v38 = vpop.permute.xlu1 %1913 }
0x1676   : > { %v1916_v7 = vmul.f32 %v3088_v63, %v1914_v38  ;;  %v1917_v21 = vmul.f32 %v3092_v4, %v1914_v38  ;;  %v1918_v47 = vmul.f32 %v3096_v23, %v1914_v38  ;;  %v357_v38 = vmul.f32 %v3088_v63, %v2761_v42 }
0x1678   : > { %1926 = vrot.lane.b32.xlu2 %v1918_v47, %s2402_s8  ;;  %1924 = vrot.lane.b32.xlu1 %v1917_v21, %s2402_s8  ;;  %v367_v21 = vadd.f32 %v2763_v43, %v359_v19  ;;  %v343_v47 = vmul.f32 %v3096_v23, %v2583_v24  ;;  %v409_v24 = vsel %vm384_vm0, %v2634_v56, %v2767_v45 }
0x1679   : > { %1922 = vrot.lane.b32.xlu0 %v1916_v7, %s2402_s8  ;;  %v358_v7 = vmul.f32 %v3092_v4, %v2761_v42  ;;  %v386_v42 = vsel %vm384_vm0, %v2630_v54, %v2765_v44  ;;  %v458_v54 = vsel %vm433_vm1, %v2638_v58, %v2773_v50  ;;  %v508_v58 = vsel %vm482_vm2, %v2779_v1, %v2663_v16 }
0x167e   : > { %v1962_v12 = vpop.permute.xlu1 %1961 }
0x167f   : > { %v1965_v0 = vmul.f32 %v3092_v4, %v1962_v12  ;;  %v1966_v33 = vmul.f32 %v3096_v23, %v1962_v12  ;;  %v1964_v62 = vmul.f32 %v3088_v63, %v1962_v12  ;;  %v351_v12 = vadd.f32 %v2587_v27, %v343_v47  ;;  %v4054_v47 = vld [vmem:[#allocation3_spill] sm:$0xff] }
0x1680   : > { %1950 = vrot.lane.b32.xlu2 %v1942_v39, %s2402_s8  ;;  %1948 = vrot.lane.b32.xlu1 %v1941_v51, %s2402_s8  ;;  %v366_v51 = vadd.f32 %v2763_v43, %v358_v7  ;;  %v416_v39 = vadd.f32 %v2652_v8, %v367_v21  ;;  %v410_v63 = vsel %vm384_vm0, %v2767_v45, %v2652_v8  ;;  %v4053_v21 = vld [vmem:[#allocation14_spill] sm:$0xff] }
0x1681   : > { %1946 = vrot.lane.b32.xlu0 %v1940_v46, %s2402_s8  ;;  %v365_v46 = vadd.f32 %v2763_v43, %v357_v38  ;;  %v350_v4 = vadd.f32 %v2587_v27, %v342_v29  ;;  %v392_v43 = vadd.f32 %v2765_v44, %v351_v12  ;;  %v459_v8 = vsel %vm433_vm1, %v2773_v50, %v2659_v14  ;;  %v4055_v29 = vld [vmem:[#allocation15_spill] sm:$0xff] }
0x1682   : > { %v415_v56 = vadd.f32 %v410_v63, %v366_v51  ;;  %v484_v44 = vsel %vm482_vm2, %v2661_v15, %v2777_v53  ;;  %v533_v15 = vsel %vm531_vm3, %v2665_v17, %v2790_v31  ;;  %v606_v17 = vsel %vm580_vm4, %v4055_v29, %v4054_v47  ;;  %v4056_v51 = vld [vmem:[#allocation11_spill] sm:$0xff] }
0x1683   : > { %v414_v45 = vadd.f32 %v409_v24, %v365_v46  ;;  %v441_v10 = vadd.f32 %v2771_v49, %v392_v43  ;;  %v4058_v24 = vld [vmem:[#allocation16_spill] sm:$0xff]  ;;  %v4060_v43 = vld [vmem:[#allocation18_spill] sm:$0xff] }
0x1688   : > { %1974 = vrot.lane.b32.xlu2 %v1966_v33, %s2404_s10  ;;  %1972 = vrot.lane.b32.xlu1 %v1965_v0, %s2404_s10  ;;  %v465_v0 = vadd.f32 %v2659_v14, %v416_v39  ;;  %v435_v33 = vsel %vm433_vm1, %v2657_v13, %v2771_v49  ;;  %v507_v13 = vsel %vm482_vm2, %v2640_v59, %v2779_v1 }
0x1689   : > { %1970 = vrot.lane.b32.xlu0 %v1964_v62, %s2404_s10  ;;  %v391_v62 = vadd.f32 %v386_v42, %v350_v4  ;;  %v490_v49 = vadd.f32 %v2777_v53, %v441_v10  ;;  %v557_v59 = vsel %vm531_vm3, %v2792_v32, %v2667_v18  ;;  %v556_v1 = vsel %vm531_vm3, %v2642_v60, %v2792_v32 }
0x168a   : > { %v514_v27 = vadd.f32 %v2663_v16, %v465_v0  ;;  %v582_v53 = vsel %vm580_vm4, %v2669_v20, %v4053_v21  ;;  %v631_v4 = vsel %vm629_vm5, %v2673_v22, %v4058_v24  ;;  %v4059_v0 = vld [vmem:[#allocation5_spill] sm:$0xff]  ;;  %v1184_v22 = vmul.f32 %v3096_v23, %v3020_v41 }
0x168b   : > { %v440_v50 = vadd.f32 %v435_v33, %v391_v62  ;;  %v539_v7 = vadd.f32 %v2790_v31, %v490_v49  ;;  %v4057_v31 = vld [vmem:[#allocation2_spill] sm:$0xff]  ;;  %v655_v33 = vsel %vm629_vm5, %v4060_v43, %v4059_v0  ;;  %v4062_v62 = vld [vmem:[#allocation20_spill] sm:$0xff] }
0x168c   : > { %v605_v63 = vsel %vm580_vm4, %v4057_v31, %v4055_v29  ;;  %v4076_v31 = vld [vmem:[#allocation17_spill] sm:$0xff] }
0x168d   : > { %v489_v19 = vadd.f32 %v484_v44, %v440_v50  ;;  %v588_v60 = vadd.f32 %v4053_v21, %v539_v7  ;;  %v4064_v44 = vld [vmem:[#allocation9_spill] sm:$0xff] }
0x168f   : > { %v538_v39 = vadd.f32 %v533_v15, %v489_v19  ;;  %v4067_v19 = vld [vmem:[#allocation21_spill] sm:$0xff] }
0x1690   : > { %1998 = vrot.lane.b32.xlu2 %v1990_v2, %s2404_s10  ;;  %1996 = vrot.lane.b32.xlu1 %v1989_v57, %s2404_s10  ;;  %v463_v57 = vadd.f32 %v458_v54, %v414_v45  ;;  %v464_v2 = vadd.f32 %v459_v8, %v415_v56  ;;  %v4061_v54 = vld [vmem:[#allocation4_spill] sm:$0xff]  ;;  %v680_v56 = vsel %vm678_vm6, %v2693_v36, %v4062_v62 }
0x1691   : > { %1994 = vrot.lane.b32.xlu0 %v1988_v25, %s2404_s10  ;;  %v563_v25 = vadd.f32 %v2667_v18, %v514_v27  ;;  %v766_v18 = vmul.f32 %v3096_v23, %v4056_v51  ;;  %v587_v32 = vadd.f32 %v582_v53, %v538_v39  ;;  %v654_v8 = vsel %vm629_vm5, %v4061_v54, %v4060_v43  ;;  %v4063_v45 = vld [vmem:[#allocation24_spill] sm:$0xff] }
0x1692   : > { %v512_v38 = vadd.f32 %v507_v13, %v463_v57  ;;  %v513_v16 = vadd.f32 %v508_v58, %v464_v2  ;;  %v780_v13 = vmul.f32 %v3096_v23, %v4064_v44  ;;  %v4065_v58 = vld [vmem:[#allocation60_spill] sm:$0xff]  ;;  %v1602_v57 = vmul.f32 %v3096_v23, %v3300_v5 }
0x1693   : > { %v612_v12 = vadd.f32 %v4054_v47, %v563_v25  ;;  %v773_v27 = vadd.f32 %v4063_v45, %v766_v18  ;;  %v1198_v50 = vmul.f32 %v3096_v23, %v4065_v58  ;;  %v636_v25 = vadd.f32 %v631_v4, %v587_v32  ;;  %v4070_v23 = vld [vmem:[#allocation12_spill] sm:$0xff]  ;;  %v4072_v18 = vld [vmem:[#allocation63_spill] sm:$0xff] }
0x1694   : > { %v562_v46 = vadd.f32 %v557_v59, %v513_v16  ;;  %v561_v42 = vadd.f32 %v556_v1, %v512_v38  ;;  %v637_v36 = vadd.f32 %v4058_v24, %v588_v60  ;;  %v4066_v59 = vld [vmem:[#allocation7_spill] sm:$0xff]  ;;  %v4068_v16 = vld [vmem:[#allocation25_spill] sm:$0xff]  ;;  %v4071_v47 = vld [vmem:[#allocation28_spill] sm:$0xff] }
0x1695   : > { %v661_v49 = vadd.f32 %v4059_v0, %v612_v12  ;;  %v704_v38 = vsel %vm678_vm6, %v4067_v19, %v4066_v59  ;;  %v787_v1 = vadd.f32 %v4068_v16, %v780_v13  ;;  %v3587_v7 = vadd.f32 %v680_v56, %v636_v25  ;;  %v4077_v24 = vld [vmem:[#allocation22_spill] sm:$0xff]  ;;  %v4078_v4 = vld [vmem:[#allocation31_spill] sm:$0xff]  ;;  %v4081_v56 = vld [vmem:[#allocation8_spill] sm:$0xff] }
0x1696   : > { %v611_v20 = vadd.f32 %v606_v17, %v562_v46  ;;  %v610_v2 = vadd.f32 %v605_v63, %v561_v42  ;;  %v686_v21 = vadd.f32 %v4062_v62, %v637_v36  ;;  %v811_v53 = vadd.f32 %v4070_v23, %v773_v27  ;;  %v4073_v42 = vld [vmem:[#allocation6_spill] sm:$0xff]  ;;  %v3623_v13 = vld [vmem:[%s2558_s26 + $0x8] sm:$0xff] }
0x1697   : > { %v835_v29 = vadd.f32 %v4071_v47, %v787_v1  ;;  %v1191_v17 = vadd.f32 %v3031_v35, %v1184_v22  ;;  %v1205_v39 = vadd.f32 %v4072_v18, %v1198_v50  ;;  %v1609_v46 = vadd.f32 %v3298_v40, %v1602_v57  ;;  %v4082_v22 = vld [vmem:[#allocation33_spill] sm:$0xff]  ;;  %v4084_v36 = vld [vmem:[#allocation67_spill] sm:$0xff] }
0x1698   : > { %v660_v15 = vadd.f32 %v655_v33, %v611_v20  ;;  %v3585_v41 = vadd.f32 %v654_v8, %v610_v2  ;;  %v710_v12 = vadd.f32 %v4066_v59, %v661_v49  ;;  %v3599_v60 = vsel %vm678_vm6, %v4073_v42, %v4067_v19  ;;  %v4079_v33 = vld [vmem:[#allocation64_spill] sm:$0xff]  ;;  %v2347_v59 = vld [vmem:[%s2558_s26] sm:$0xff] }
0x1699   : > { %4074 = vst [vmem:[#allocation3_spill] sm:$0xff] %v3599_v60  ;;  %v859_v63 = vadd.f32 %v4076_v31, %v811_v53  ;;  %v3609_v35 = vsel %vm727_vm7, %v2713_v48, %v4077_v24  ;;  %v883_v0 = vadd.f32 %v4078_v4, %v835_v29  ;;  %v1229_v43 = vadd.f32 %v3044_v34, %v1191_v17  ;;  %v4083_v34 = vld [vmem:[#allocation36_spill] sm:$0xff]  ;;  %v4086_v29 = vld [vmem:[#allocation41_spill] sm:$0xff] }
0x169a   : > { %4069 = vst [vmem:[#allocation14_spill] sm:$0xff] %v3585_v41  ;;  %v3601_v32 = vadd.f32 %v704_v38, %v660_v15  ;;  %v1253_v54 = vadd.f32 %v4079_v33, %v1205_v39  ;;  %v3617_v62 = vadd.f32 %v4077_v24, %v686_v21  ;;  %v3620_v27 = vadd.f32 %v4081_v56, %v710_v12  ;;  %v4085_v21 = vld [vmem:[#allocation38_spill] sm:$0xff]  ;;  %v4087_v12 = vld [vmem:[#allocation69_spill] sm:$0xff] }
0x169b   : > { %v779_v48 = vmul.f32 %v3623_v13, %v4064_v44  ;;  %v907_v50 = vadd.f32 %v4082_v22, %v859_v63  ;;  %v931_v2 = vadd.f32 %v4083_v34, %v883_v0  ;;  %v1277_v25 = vadd.f32 %v3064_v6, %v1229_v43  ;;  %v4089_v24 = vld [vmem:[#allocation13_spill] sm:$0xff]  ;;  %v4090_v0 = vld [vmem:[#allocation27_spill] sm:$0xff] }
0x169c   : > { %4075 = vst [vmem:[#allocation15_spill] sm:$0xff] %v3601_v32  ;;  %v1301_v49 = vadd.f32 %v4084_v36, %v1253_v54  ;;  %v1647_v15 = vadd.f32 %v3318_v9, %v1609_v46  ;;  %v778_v19 = vmul.f32 %v2347_v59, %v4064_v44  ;;  %v765_v1 = vmul.f32 %v3623_v13, %v4056_v51  ;;  %v4088_v46 = vld [vmem:[#allocation26_spill] sm:$0xff]  ;;  %v4091_v43 = vld [vmem:[#allocation43_spill] sm:$0xff] }
0x169d   : > { %v786_v38 = vadd.f32 %v4068_v16, %v779_v48  ;;  %v955_v53 = vadd.f32 %v4085_v21, %v907_v50  ;;  %v979_v17 = vadd.f32 %v4086_v29, %v931_v2  ;;  %v1325_v39 = vadd.f32 %v3112_v3, %v1277_v25  ;;  %v4092_v48 = vld [vmem:[#allocation46_spill] sm:$0xff]  ;;  %v4094_v25 = vld [vmem:[#allocation72_spill] sm:$0xff] }
0x169e   : > { %v1349_v6 = vadd.f32 %v4087_v12, %v1301_v49  ;;  %v1695_v42 = vadd.f32 %v3349_v37, %v1647_v15  ;;  %v805_v63 = vsel %vm384_vm0, %v4088_v46, %v4070_v23  ;;  %v785_v44 = vadd.f32 %v4068_v16, %v778_v19  ;;  %v4093_v2 = vld [vmem:[#allocation70_spill] sm:$0xff]  ;;  %v4095_v23 = vld [vmem:[#allocation29_spill] sm:$0xff]  ;;  %v4096_v46 = vld [vmem:[#allocation48_spill] sm:$0xff] }
0x169f   : > { %v828_v51 = vsel %vm384_vm0, %v4090_v0, %v4089_v24  ;;  %v1003_v54 = vadd.f32 %v4091_v43, %v955_v53  ;;  %v1027_v50 = vadd.f32 %v4092_v48, %v979_v17  ;;  %v1373_v3 = vadd.f32 %v4093_v2, %v1325_v39  ;;  %v4097_v0 = vld [vmem:[#allocation51_spill] sm:$0xff]  ;;  %v4101_v32 = vld [vmem:[#allocation30_spill] sm:$0xff] }
0x16a0   : > { %v1397_v49 = vadd.f32 %v4094_v25, %v1349_v6  ;;  %v1743_v15 = vadd.f32 %v3374_v52, %v1695_v42  ;;  %v772_v59 = vadd.f32 %v4063_v45, %v765_v1  ;;  %v829_v16 = vsel %vm384_vm0, %v4089_v24, %v4071_v47  ;;  %v4099_v2 = vld [vmem:[#allocation75_spill] sm:$0xff]  ;;  %v4102_v24 = vld [vmem:[#allocation53_spill] sm:$0xff] }
0x16a1   : > { %v853_v19 = vsel %vm433_vm1, %v4095_v23, %v4076_v31  ;;  %v1051_v53 = vadd.f32 %v4096_v46, %v1003_v54  ;;  %v1075_v17 = vadd.f32 %v4097_v0, %v1027_v50  ;;  %v1421_v39 = vadd.f32 %v4098_v11, %v1373_v3  ;;  %v4100_v1 = vld [vmem:[#allocation19_spill] sm:$0xff]  ;;  %v4104_v54 = vld [vmem:[#allocation56_spill] sm:$0xff]  ;;  %v4106_v3 = vld [vmem:[#allocation78_spill] sm:$0xff] }
0x16a2   : > { %v1445_v6 = vadd.f32 %v4099_v2, %v1397_v49  ;;  %v1791_v42 = vadd.f32 %v3399_v61, %v1743_v15  ;;  %v810_v55 = vadd.f32 %v805_v63, %v772_v59  ;;  %v833_v45 = vadd.f32 %v828_v51, %v785_v44  ;;  %v4105_v23 = vld [vmem:[#allocation76_spill] sm:$0xff]  ;;  %v4107_v59 = vld [vmem:[#allocation61_spill] sm:$0xff]  ;;  %v4109_v2 = vld [vmem:[#allocation79_spill] sm:$0xff] }
0x16a3   : > { %v876_v47 = vsel %vm433_vm1, %v4101_v32, %v4100_v1  ;;  %v1099_v60 = vadd.f32 %v4102_v24, %v1051_v53  ;;  %v1123_v50 = vadd.f32 %v4104_v54, %v1075_v17  ;;  %v1469_v11 = vadd.f32 %v4105_v23, %v1421_v39 }
0x16a4   : > { %v1493_v49 = vadd.f32 %v4106_v3, %v1445_v6  ;;  %v1839_v15 = vadd.f32 %v3428_v30, %v1791_v42  ;;  %v834_v44 = vadd.f32 %v829_v16, %v786_v38  ;;  %v858_v51 = vadd.f32 %v853_v19, %v810_v55  ;;  %v4111_v42 = vld [vmem:[#allocation32_spill] sm:$0xff]  ;;  %v4112_v55 = vld [vmem:[#allocation34_spill] sm:$0xff]  ;;  %v4113_v16 = vld [vmem:[#allocation35_spill] sm:$0xff] }
0x16a5   : > { %v877_v32 = vsel %vm433_vm1, %v4100_v1, %v4078_v4  ;;  %v1147_v53 = vadd.f32 %v4107_v59, %v1099_v60  ;;  %v1517_v17 = vadd.f32 %v4109_v2, %v1469_v11  ;;  %v881_v23 = vadd.f32 %v876_v47, %v833_v45  ;;  %v4114_v4 = vld [vmem:[#allocation83_spill] sm:$0xff]  ;;  %v4115_v2 = vld [vmem:[#allocation85_spill] sm:$0xff] }
0x16a6   : > { %v901_v38 = vsel %vm482_vm2, %v4111_v42, %v4082_v22  ;;  %v924_v19 = vsel %vm482_vm2, %v4113_v16, %v4112_v55  ;;  %v925_v60 = vsel %vm482_vm2, %v4112_v55, %v4083_v34  ;;  %v882_v47 = vadd.f32 %v877_v32, %v834_v44  ;;  %v4116_v22 = vld [vmem:[#allocation37_spill] sm:$0xff]  ;;  %v4118_v42 = vld [vmem:[#allocation40_spill] sm:$0xff] }
0x16a7   : > { %v1565_v1 = vadd.f32 %v4114_v4, %v1517_v17  ;;  %v1601_v34 = vmul.f32 %v3623_v13, %v3300_v5  ;;  %v1174_v17 = vmax.f32 %v3617_v62, %v1147_v53  ;;  %v3718_v44 = vadd.f32 %v3609_v35, %v3587_v7  ;;  %v4119_v62 = vld [vmem:[#allocation88_spill] sm:$0xff] }
0x16a8   : > { %v929_v32 = vadd.f32 %v924_v19, %v881_v23  ;;  %v930_v55 = vadd.f32 %v925_v60, %v882_v47  ;;  %v1197_v7 = vmul.f32 %v3623_v13, %v4065_v58  ;;  %v4123_v47 = vld [vmem:[#allocation45_spill] sm:$0xff] }
0x16a9   : > { %v1608_v35 = vadd.f32 %v3298_v40, %v1601_v34  ;;  %v4124_v40 = vld [vmem:[#allocation47_spill] sm:$0xff] }
0x16b2   : > { %v3482_v28 = vpop.permute.xlu2 %1878 }
0x16b3   : > { %v1887_v6 = vadd.f32 %v3482_v28, %v1839_v15  ;;  %v4117_v15 = vld [vmem:[#allocation39_spill] sm:$0xff] }
0x16b4   : > { %v972_v16 = vsel %vm531_vm3, %v4118_v42, %v4117_v15 }
0x16ba   : > { %v3529_v14 = vpop.permute.xlu2 %1902 }
0x16bb   : > { %v1911_v11 = vadd.f32 %v3529_v14, %v3452_v26 }
0x16ca   : > { %v3614_v8 = vpop.permute.xlu0 %1874 }
0x16cb   : > { %v3604_v20 = vpop.permute.xlu1 %1876  ;;  %4080 = vst [vmem:[#allocation11_spill] sm:$0xff] %v3614_v8  ;;  %v4110_v8 = vld [vmem:[#allocation81_spill] sm:$0xff] }
0x16cc   : > { %v1541_v39 = vadd.f32 %v4110_v8, %v1493_v49  ;;  %v949_v49 = vsel %vm531_vm3, %v4116_v22, %v4085_v21  ;;  %v906_v21 = vadd.f32 %v901_v38, %v858_v51  ;;  %v1592_v22 = vmax.f32 %v1174_v17, %v1565_v1  ;;  %v4120_v51 = vld [vmem:[#allocation42_spill] sm:$0xff]  ;;  %v4121_v38 = vld [vmem:[#allocation89_spill] sm:$0xff] }
0x16cd   : > { %v997_v23 = vsel %vm580_vm4, %v4120_v51, %v4091_v43  ;;  %v1689_v19 = vsel %vm433_vm1, %v4121_v38, %v3349_v37  ;;  %v973_v1 = vsel %vm531_vm3, %v4117_v15, %v4086_v29  ;;  %v1045_v37 = vsel %vm629_vm5, %v4124_v40, %v4096_v46  ;;  %v4125_v43 = vld [vmem:[#allocation65_spill] sm:$0xff]  ;;  %v4127_v46 = vld [vmem:[#allocation52_spill] sm:$0xff]  ;;  %v4138_v40 = vld [vmem:[#allocation23_spill] sm:$0xff] }
0x16ce   : > { %v1247_v29 = vsel %vm384_vm0, %v4125_v43, %v4079_v33  ;;  %v1204_v17 = vadd.f32 %v4072_v18, %v1197_v7  ;;  %v4128_v33 = vld [vmem:[#allocation66_spill] sm:$0xff] }
0x16d2   : > { %v3569_v10 = vpop.permute.xlu2 %1926  ;;  %v3680_v63 = vpop.permute.xlu0 %1898 }
0x16d3   : > { %v3672_v41 = vpop.permute.xlu1 %1900  ;;  %v1935_v45 = vadd.f32 %v3569_v10, %v1887_v6 }
0x16d4   : > { %4103 = vst [vmem:[#allocation2_spill] sm:$0xff] %v3672_v41  ;;  %v4108_v41 = vld [vmem:[#allocation59_spill] sm:$0xff] }
0x16d5   : > { %v1171_v56 = vadd.f32 %v4108_v41, %v1123_v50  ;;  %v1589_v50 = vadd.f32 %v4115_v2, %v1541_v39 }
0x16d7   : > { %v1177_v39 = vmax.f32 %v3620_v27, %v1171_v56  ;;  %v1641_v56 = vsel %vm384_vm0, %v4119_v62, %v3318_v9 }
0x16d8   : > { %v1646_v13 = vadd.f32 %v1641_v56, %v1608_v35 }
0x16d9   : > { %v1595_v5 = vmax.f32 %v1177_v39, %v1589_v50  ;;  %v4122_v50 = vld [vmem:[#allocation44_spill] sm:$0xff] }
0x16da   : > { %v3628_v57 = vpop.permute.xlu2 %1950  ;;  %v1020_v58 = vsel %vm580_vm4, %v4123_v47, %v4122_v50  ;;  %v1021_v34 = vsel %vm580_vm4, %v4122_v50, %v4092_v48  ;;  %v1694_v39 = vadd.f32 %v1689_v19, %v1646_v13  ;;  %v1252_v48 = vadd.f32 %v1247_v29, %v1204_v17  ;;  %v4134_v19 = vld [vmem:[#allocation50_spill] sm:$0xff]  ;;  %v4140_v29 = vld [vmem:[#allocation75_spill] sm:$0xff] }
0x16db   : > { %v1959_v26 = vadd.f32 %v3628_v57, %v1911_v11  ;;  %v954_v11 = vadd.f32 %v949_v49, %v906_v21  ;;  %v4126_v49 = vld [vmem:[#allocation90_spill] sm:$0xff]  ;;  %v1295_v21 = vsel %vm433_vm1, %v4128_v33, %v4084_v36  ;;  %v4132_v36 = vld [vmem:[#allocation92_spill] sm:$0xff]  ;;  %v4142_v17 = vld [vmem:[#allocation55_spill] sm:$0xff] }
0x16dc   : > { %v1737_v15 = vsel %vm482_vm2, %v4126_v49, %v3374_v52  ;;  %v4129_v52 = vld [vmem:[#allocation91_spill] sm:$0xff]  ;;  %v1833_v7 = vsel %vm580_vm4, %v4132_v36, %v3428_v30  ;;  %v4141_v49 = vld [vmem:[#allocation74_spill] sm:$0xff] }
0x16dd   : > { %v1742_v62 = vadd.f32 %v1737_v15, %v1694_v39 }
0x16e2   : > { %v3674_v31 = vpop.permute.xlu2 %1974 }
0x16e3   : > { %v1983_v6 = vadd.f32 %v3674_v31, %v1935_v45  ;;  %v977_v45 = vadd.f32 %v972_v16, %v929_v32  ;;  %v1002_v16 = vadd.f32 %v997_v23, %v954_v11  ;;  %v1785_v32 = vsel %vm531_vm3, %v4129_v52, %v3399_v61  ;;  %v4145_v52 = vld [vmem:[#allocation62_spill] sm:$0xff] }
0x16e4   : > { %v1300_v23 = vadd.f32 %v1295_v21, %v1252_v48  ;;  %v1790_v38 = vadd.f32 %v1785_v32, %v1742_v62  ;;  %v4147_v48 = vld [vmem:[#allocation80_spill] sm:$0xff] }
0x16e5   : > { %v2010_v60 = vmax.f32 %v1592_v22, %v1983_v6  ;;  %v1093_v6 = vsel %vm678_vm6, %v4127_v46, %v4102_v24  ;;  %v1025_v22 = vadd.f32 %v1020_v58, %v977_v45  ;;  %v4131_v24 = vld [vmem:[#allocation68_spill] sm:$0xff]  ;;  %v4133_v45 = vld [vmem:[#allocation49_spill] sm:$0xff]  ;;  %v4137_v58 = vld [vmem:[#allocation11_spill] sm:$0xff]  ;;  %v1535_v62 = vsel %vm678_vm6, %v4147_v48, %v4110_v8 }
0x16e6   : > { %v1343_v11 = vsel %vm482_vm2, %v4131_v24, %v4087_v12  ;;  %v1069_v35 = vsel %vm629_vm5, %v4133_v45, %v4097_v0  ;;  %v1838_v47 = vadd.f32 %v1833_v7, %v1790_v38  ;;  %v1880_v13 = vsel %vm629_vm5, %v4137_v58, %v3604_v20  ;;  %v4149_v7 = vld [vmem:[#allocation8_spill] sm:$0xff] }
0x16e7   : > { %v1348_v50 = vadd.f32 %v1343_v11, %v1300_v23 }
0x16ea   : > { %v3720_v4 = vpop.permute.xlu2 %1998  ;;  %v1925_v2 = vpop.permute.xlu1 %1924 }
0x16eb   : > { %v1923_v27 = vpop.permute.xlu0 %1922  ;;  %v2007_v53 = vadd.f32 %v3720_v4, %v1959_v26  ;;  %v978_v26 = vadd.f32 %v973_v1, %v930_v55  ;;  %v4130_v55 = vld [vmem:[#allocation57_spill] sm:$0xff]  ;;  %v1881_v1 = vsel %vm629_vm5, %v3604_v20, %v3482_v28  ;;  %v1929_v15 = vsel %vm678_vm6, %v1925_v2, %v3569_v10  ;;  %v4146_v10 = vld [vmem:[#allocation58_spill] sm:$0xff] }
0x16ec   : > { %v1164_v32 = vsel %vm727_vm7, %v4146_v10, %v4145_v52 }
0x16ed   : > { %v2013_v9 = vmax.f32 %v1595_v5, %v2007_v53  ;;  %v1050_v5 = vadd.f32 %v1045_v37, %v1002_v16  ;;  %v1026_v56 = vadd.f32 %v1021_v34, %v978_v26  ;;  %v1141_v53 = vsel %vm727_vm7, %v4130_v55, %v4107_v59  ;;  %v4139_v37 = vld [vmem:[#allocation10_spill] sm:$0xff]  ;;  %v4143_v26 = vld [vmem:[#allocation77_spill] sm:$0xff] }
0x16ee   : > { %v1068_v59 = vsel %vm629_vm5, %v4134_v19, %v4133_v45  ;;  %v752_v43 = vsel %vm727_vm7, %v4139_v37, %v4138_v40  ;;  %v1886_v16 = vadd.f32 %v1881_v1, %v1838_v47  ;;  %v1928_v34 = vsel %vm678_vm6, %v1923_v27, %v1925_v2  ;;  %v4153_v1 = vld [vmem:[#allocation82_spill] sm:$0xff] }
0x16ef   : > { %v2016_v42 = vsub.f32 %v2010_v60, %v2013_v9  ;;  %v1098_v51 = vadd.f32 %v1093_v6, %v1050_v5  ;;  %v4135_v60 = vld [vmem:[#allocation54_spill] sm:$0xff]  ;;  %v4136_v9 = vld [vmem:[#allocation71_spill] sm:$0xff]  ;;  %v1073_v28 = vadd.f32 %v1068_v59, %v1025_v22  ;;  %v1487_v46 = vsel %vm629_vm5, %v4143_v26, %v4106_v3  ;;  %v4144_v6 = vld [vmem:[#allocation93_spill] sm:$0xff] }
0x16f0   : > { %v1117_v12 = vsel %vm678_vm6, %v4135_v60, %v4104_v54  ;;  %v1391_v30 = vsel %vm531_vm3, %v4136_v9, %v4094_v25  ;;  %v1074_v54 = vadd.f32 %v1069_v35, %v1026_v56  ;;  %v1439_v25 = vsel %vm580_vm4, %v4141_v49, %v4140_v29  ;;  %v4150_v35 = vld [vmem:[#allocation2_spill] sm:$0xff] }
0x16f1   : > { %2020 = vst.msk [vmem:[%s3746_s9 + $0x10] sm:$0xff] %vm2019_vm8, %v2016_v42  ;;  %v1146_v0 = vadd.f32 %v1141_v53, %v1098_v51  ;;  %v1396_v42 = vadd.f32 %v1391_v30, %v1348_v50  ;;  %v1116_v20 = vsel %vm678_vm6, %v4142_v17, %v4135_v60  ;;  %v1885_v33 = vadd.f32 %v1880_v13, %v4144_v6  ;;  %v4148_v53 = vld [vmem:[#allocation84_spill] sm:$0xff]  ;;  %v4151_v59 = vld [vmem:[#allocation14_spill] sm:$0xff]  ;;  %v4152_v60 = vld [vmem:[#allocation3_spill] sm:$0xff] }
0x16f2   : > { %v1949_v18 = vpop.permute.xlu1 %1948  ;;  %v1122_v39 = vadd.f32 %v1117_v12, %v1074_v54  ;;  %v1934_v5 = vadd.f32 %v1929_v15, %v1886_v16  ;;  %v1165_v27 = vsel %vm727_vm7, %v4145_v52, %v4108_v41  ;;  %v753_v45 = vsel %vm727_vm7, %v4138_v40, %v4149_v7  ;;  %v4154_v50 = vld [vmem:[#allocation15_spill] sm:$0xff] }
0x16f3   : > { %v1947_v61 = vpop.permute.xlu0 %1946  ;;  %v1173_v21 = vmax.f32 %v3718_v44, %v1146_v0  ;;  %v1444_v22 = vadd.f32 %v1439_v25, %v1396_v42  ;;  %v1933_v3 = vadd.f32 %v1928_v34, %v1885_v33  ;;  %v1121_v41 = vadd.f32 %v1116_v20, %v1073_v28  ;;  %v4156_v13 = vld [vmem:[#allocation95_spill] sm:$0xff] }
0x16f4   : > { %v1905_v8 = vsel %vm629_vm5, %v4150_v35, %v3529_v14  ;;  %v1170_v23 = vadd.f32 %v1165_v27, %v1122_v39  ;;  %v708_v12 = vadd.f32 %v4152_v60, %v4151_v59  ;;  %v1953_v30 = vsel %vm678_vm6, %v1949_v18, %v3628_v57  ;;  %v4155_v14 = vld [vmem:[#allocation86_spill] sm:$0xff]  ;;  %v4158_v39 = vld [vmem:[#allocation87_spill] sm:$0xff] }
0x16f5   : > { %v1492_v55 = vadd.f32 %v1487_v46, %v1444_v22  ;;  %v1591_v24 = vmax.f32 %v1173_v21, %v4148_v53  ;;  %v1169_v9 = vadd.f32 %v1164_v32, %v1121_v41  ;;  %v758_v47 = vadd.f32 %v753_v45, %v4154_v50 }
0x16f6   : > { %v1910_v40 = vadd.f32 %v1905_v8, %v4156_v13  ;;  %v1952_v37 = vsel %vm678_vm6, %v1947_v61, %v1949_v18  ;;  %v757_v54 = vadd.f32 %v752_v43, %v708_v12 }
0x16f7   : > { %v1540_v38 = vadd.f32 %v1535_v62, %v1492_v55  ;;  %v1176_v49 = vmax.f32 %v758_v47, %v1170_v23 }
0x16f8   : > { %v1958_v25 = vadd.f32 %v1953_v30, %v1910_v40  ;;  %v1175_v28 = vmax.f32 %v757_v54, %v1169_v9 }
0x16f9   : > { %v1588_v58 = vadd.f32 %v4155_v14, %v1540_v38 }
0x16fa   : > { %v1973_v2 = vpop.permute.xlu1 %1972  ;;  %v1593_v18 = vmax.f32 %v1175_v28, %v4158_v39 }
0x16fb   : > { %v1971_v56 = vpop.permute.xlu0 %1970  ;;  %v1977_v44 = vsel %vm727_vm7, %v1973_v2, %v3674_v31  ;;  %v1904_v31 = vsel %vm629_vm5, %v3680_v63, %v4150_v35  ;;  %v4157_v63 = vld [vmem:[#allocation94_spill] sm:$0xff]  ;;  %v1594_v34 = vmax.f32 %v1176_v49, %v1588_v58 }
0x16fc   : > { %v1976_v11 = vsel %vm727_vm7, %v1971_v56, %v1973_v2  ;;  %v1982_v36 = vadd.f32 %v1977_v44, %v1934_v5  ;;  %v1909_v29 = vadd.f32 %v1904_v31, %v4157_v63 }
0x16fd   : > { %v1981_v51 = vadd.f32 %v1976_v11, %v1933_v3 }
0x16fe   : > { %v2009_v19 = vmax.f32 %v1591_v24, %v1982_v36  ;;  %v1957_v57 = vadd.f32 %v1952_v37, %v1909_v29 }
0x16ff   : > { %v2008_v0 = vmax.f32 %v4153_v1, %v1981_v51 }
0x1702   : > { %v1997_v15 = vpop.permute.xlu1 %1996 }
0x1703   : > { %v1995_v42 = vpop.permute.xlu0 %1994  ;;  %v2001_v16 = vsel %vm727_vm7, %v1997_v15, %v3720_v4 }
0x1704   : > { %v2000_v17 = vsel %vm727_vm7, %v1995_v42, %v1997_v15  ;;  %v2006_v20 = vadd.f32 %v2001_v16, %v1958_v25 }
0x1705   : > { %v2005_v61 = vadd.f32 %v2000_v17, %v1957_v57 }
0x1706   : > { %v2012_v43 = vmax.f32 %v1594_v34, %v2006_v20 }
0x1707   : > { %v2011_v26 = vmax.f32 %v1593_v18, %v2005_v61 }
0x1708   : > { %v2015_v46 = vsub.f32 %v2009_v19, %v2012_v43 }
0x1709   : > { %v2014_v6 = vsub.f32 %v2008_v0, %v2011_v26 }
0x170a   : > { %2018 = vst [vmem:[%s3746_s9 + $0x8] sm:$0xff] %v2015_v46 }
0x170b   : > { %2017 = vst [vmem:[%s3746_s9] sm:$0xff] %v2014_v6 }
0x170c PF: > { %s15_s22 = sadd.s32 1, %s2386_s22   ;;  %s4159_s18 = smov %s2378_s20 }
0x170d   : > { %p12_p7 = scmp.ge.s32.totalorder %s15_s22, 6   ;;  %s4160_s19 = smov %s2382_s21 }
0x170e   : > { %s4161_s20 = smov %s4164_s23  ;;  %s4162_s21 = smov %s4168_s24 }
0x170f   :  { %14 = sbr.rel (!%p12_p7) target bundleno = 3 (0x3), region = 82 }

</bundles_post_ra>
